<compile_context>
chip_gen: v7x
topology: tpu7x:2x2x1
jax: 0.10.0
libtpu: 0.0.40
codegen_flags: <defaults>
</compile_context>

<pallas_src>
import jax
import jax.numpy as jnp
from jax.experimental import pallas as pl
from jax.experimental.pallas import tpu as pltpu

HIDDEN = 64
INPUT_SIZE = 1500
NUM_LAYERS = 3
NUM_CLASSES = 2


def _round_up(x, m):
    return (x + m - 1) // m * m


# ---------------------------------------------------------------------------
# Kernel 1: fused input projection for BOTH directions of one layer.
#   gates = x @ [W_ih_f^T | W_ih_b^T] + [b_f | b_b]     -> (rows, 8H)
# One big MXU-friendly matmul (K = D_in, N = 512) instead of 2*T tiny ones.
# ---------------------------------------------------------------------------
def _proj_kernel(x_ref, w_ref, b_ref, o_ref):
    o_ref[...] = (
        jnp.dot(x_ref[...], w_ref[...], preferred_element_type=jnp.float32)
        + b_ref[...]
    )


def input_projection(x_flat, w_cat_bf16, b_cat):
    """x_flat: (N, D).  Returns (N, 8H) f32 pre-activations for fwd||bwd gates."""
    N, D = x_flat.shape
    G = w_cat_bf16.shape[1]
    x_bf16 = x_flat.astype(jnp.bfloat16)

    if N <= 512:
        # single block == full array (no tiling constraints, no padding needed)
        tm, npad = N, N
    else:
        tm = 256
        npad = _round_up(N, tm)
        if npad != N:
            x_bf16 = jnp.pad(x_bf16, ((0, npad - N), (0, 0)))

    out = pl.pallas_call(
        _proj_kernel,
        out_shape=jax.ShapeDtypeStruct((npad, G), jnp.float32),
        grid_spec=pltpu.PrefetchScalarGridSpec(
            num_scalar_prefetch=0,
            grid=(npad // tm,),
            in_specs=[
                pl.BlockSpec((tm, D), lambda i: (i, 0)),
                pl.BlockSpec((D, G), lambda i: (0, 0)),   # weights constant across grid
                pl.BlockSpec((1, G), lambda i: (0, 0)),
            ],
            out_specs=pl.BlockSpec((tm, G), lambda i: (i, 0)),
        ),
        compiler_params=pltpu.CompilerParams(
            dimension_semantics=("parallel",)),
    )(x_bf16, w_cat_bf16, b_cat)
    return out[:N]


# ---------------------------------------------------------------------------
# Kernel 2: bidirectional LSTM recurrence for one layer.
# Whole pre-activation sequence resident in VMEM; a single fori_loop walks time
# (forward direction at index t, backward direction at index T-1-t), so there is
# no per-timestep grid/pipeline overhead and no K=1500 matmul in the loop.
# Output is a fused (T, B, 2H) block (128 lanes).
# NOTE: for very long sequences (T*B*8H*4B approaching the scoped-VMEM limit),
# this call should be chunked over T with state carried across chunks.
# ---------------------------------------------------------------------------
def _bilstm_layer_kernel(g_ref, whf_ref, whb_ref, out_ref):
    # g_ref  : (T, B, 8H) f32 -- [..., :4H] fwd pre-activations, [..., 4H:] bwd.
    # whf/whb: (H, 4H) bf16   -- W_hh^T per direction.
    # out_ref: (T, B, 2H) f32 -- [..., :H] forward h_t, [..., H:] backward h_t.
    T, B, _ = g_ref.shape
    H = whf_ref.shape[0]
    H4 = 4 * H

    wh_f = whf_ref[...]
    wh_b = whb_ref[...]
    zeros = jnp.zeros((B, H), jnp.float32)

    def step(t, carry):
        h_f, c_f, h_b, c_b = carry
        t_rev = T - 1 - t

        row_f = g_ref[t]        # (B, 8H)
        row_b = g_ref[t_rev]    # (B, 8H)

        gf = row_f[:, 0:H4] + jnp.dot(
            h_f.astype(jnp.bfloat16), wh_f, preferred_element_type=jnp.float32)
        gb = row_b[:, H4:2 * H4] + jnp.dot(
            h_b.astype(jnp.bfloat16), wh_b, preferred_element_type=jnp.float32)

        # Full-slab transcendentals (one EUP pass over the whole (B,4H) slab),
        # then 64-lane gate slices.  PyTorch gate order: i, f, g, o.
        sf, thf = jax.nn.sigmoid(gf), jnp.tanh(gf)
        sb, thb = jax.nn.sigmoid(gb), jnp.tanh(gb)

        c_f_n = sf[:, H:2 * H] * c_f + sf[:, 0:H] * thf[:, 2 * H:3 * H]
        h_f_n = sf[:, 3 * H:4 * H] * jnp.tanh(c_f_n)
        c_b_n = sb[:, H:2 * H] * c_b + sb[:, 0:H] * thb[:, 2 * H:3 * H]
        h_b_n = sb[:, 3 * H:4 * H] * jnp.tanh(c_b_n)

        out_ref[pl.ds(t, 1), :, 0:H] = h_f_n[None]
        out_ref[pl.ds(t_rev, 1), :, H:2 * H] = h_b_n[None]
        return h_f_n, c_f_n, h_b_n, c_b_n

    jax.lax.fori_loop(0, T, step, (zeros, zeros, zeros, zeros))


def bilstm_layer(gates_tm, wh_f_bf16, wh_b_bf16):
    """gates_tm: (T, B, 8H) f32.  Returns (T, B, 2H) f32 (fwd || bwd hidden)."""
    T, B, _ = gates_tm.shape
    H = wh_f_bf16.shape[0]
    return pl.pallas_call(
        _bilstm_layer_kernel,
        out_shape=jax.ShapeDtypeStruct((T, B, 2 * H), jnp.float32),
        in_specs=[
            pl.BlockSpec(memory_space=pltpu.MemorySpace.VMEM),
            pl.BlockSpec(memory_space=pltpu.MemorySpace.VMEM),
            pl.BlockSpec(memory_space=pltpu.MemorySpace.VMEM),
        ],
        out_specs=pl.BlockSpec(memory_space=pltpu.MemorySpace.VMEM),
    )(gates_tm, wh_f_bf16, wh_b_bf16)


# ---------------------------------------------------------------------------
# Parameters: PyTorch-layout init (uniform(-1/sqrt(H), 1/sqrt(H))) + packing
# into kernel-ready (transposed / concatenated / bf16) tensors.
# ---------------------------------------------------------------------------
def init_params(key):
    params = {"lstm": []}
    bound = 1.0 / (HIDDEN ** 0.5)
    for layer in range(NUM_LAYERS):
        in_sz = INPUT_SIZE if layer == 0 else 2 * HIDDEN
        dirs = []
        for _direction in range(2):
            key, k1, k2, k3, k4 = jax.random.split(key, 5)
            w_ih = jax.random.uniform(k1, (4 * HIDDEN, in_sz), jnp.float32, -bound, bound)
            w_hh = jax.random.uniform(k2, (4 * HIDDEN, HIDDEN), jnp.float32, -bound, bound)
            b_ih = jax.random.uniform(k3, (4 * HIDDEN,), jnp.float32, -bound, bound)
            b_hh = jax.random.uniform(k4, (4 * HIDDEN,), jnp.float32, -bound, bound)
            dirs.append((w_ih, w_hh, b_ih, b_hh))
        params["lstm"].append(dirs)
    key, kf1, kf2 = jax.random.split(key, 3)
    fbound = 1.0 / ((2 * HIDDEN) ** 0.5)
    params["fc_w"] = jax.random.uniform(kf1, (NUM_CLASSES, 2 * HIDDEN), jnp.float32, -fbound, fbound)
    params["fc_b"] = jax.random.uniform(kf2, (NUM_CLASSES,), jnp.float32, -fbound, fbound)
    return params


def pack_params(params):
    packed = {"layers": []}
    for dirs in params["lstm"]:
        (wif, whf, bif, bhf), (wib, whb, bib, bhb) = dirs
        w_cat = jnp.concatenate([wif, wib], axis=0).T.astype(jnp.bfloat16)       # (D, 8H)
        b_cat = jnp.concatenate([bif + bhf, bib + bhb]).reshape(1, -1).astype(jnp.float32)  # (1, 8H)
        packed["layers"].append({
            "w_cat": w_cat,
            "b_cat": b_cat,
            "wh_f": whf.T.astype(jnp.bfloat16),    # (H, 4H)
            "wh_b": whb.T.astype(jnp.bfloat16),    # (H, 4H)
        })
    packed["fc_w_t"] = params["fc_w"].T.astype(jnp.float32)   # (2H, C)
    packed["fc_b"] = params["fc_b"].astype(jnp.float32)       # (C,)
    return packed


# ---------------------------------------------------------------------------
# Full forward pass:  x (B, T, 1500)  ->  (B, T, 2)
# ---------------------------------------------------------------------------
def bilstm_forward(packed, x):
    B, T, _ = x.shape
    h = jnp.transpose(x, (1, 0, 2)).astype(jnp.float32)   # time-major (T, B, D)

    for layer in packed["layers"]:
        T_, B_, D = h.shape
        gates = input_projection(h.reshape(T_ * B_, D), layer["w_cat"], layer["b_cat"])
        gates = gates.reshape(T_, B_, -1)                  # (T, B, 8H)
        h = bilstm_layer(gates, layer["wh_f"], layer["wh_b"])   # (T, B, 2H)

    # Final Linear(128 -> 2): negligible FLOPs, plain XLA dot (per perf review).
    logits = jnp.einsum("tbf,fc->tbc", h, packed["fc_w_t"]) + packed["fc_b"]
    return jnp.transpose(logits, (1, 0, 2))                # back to batch-first (B, T, 2)


if __name__ == "__main__":
    B, T = 2, 8
    key = jax.random.PRNGKey(0)
    key, xk = jax.random.split(key)
    x = jax.random.normal(xk, (B, T, INPUT_SIZE), jnp.float32)

    params = init_params(jax.random.PRNGKey(1))
    packed = pack_params(params)

    fwd = jax.jit(bilstm_forward)
    out = jax.block_until_ready(fwd(packed, x))

    assert out.shape == (B, T, NUM_CLASSES), out.shape
    assert out.dtype == jnp.float32
    assert bool(jnp.all(jnp.isfinite(out)))
    print("KERNEL_OK")
</pallas_src>

<mosaic_0001>
module attributes {stable_mosaic.version = 11 : i64} {
  func.func @_proj_kernel(%arg0: i32, %arg1: memref<16x1500xbf16, #tpu.memory_space<vmem>>, %arg2: memref<1500x512xbf16, #tpu.memory_space<vmem>>, %arg3: memref<1x512xf32, #tpu.memory_space<vmem>>, %arg4: memref<16x512xf32, #tpu.memory_space<vmem>>) attributes {dimension_semantics = [#tpu.dimension_semantics<parallel>], iteration_bounds = array<i64: 1>, scalar_prefetch = 0 : i64, scratch_operands = 0 : i64, tpu.core_type = #tpu.core_type<tc>, window_params = [{transform_indices = @transform_0, window_bounds = array<i64: 16, 1500>}, {pipeline_mode = #tpu.pipeline_mode<synchronous>, transform_indices = @transform_1, window_bounds = array<i64: 1500, 512>}, {pipeline_mode = #tpu.pipeline_mode<synchronous>, transform_indices = @transform_2, window_bounds = array<i64: 1, 512>}, {transform_indices = @transform_3, window_bounds = array<i64: 16, 512>}]} {
    %c0 = arith.constant 0 : index
    %c0_0 = arith.constant 0 : index
    %0 = vector.load %arg1[%c0, %c0_0] : memref<16x1500xbf16, #tpu.memory_space<vmem>>, vector<16x1500xbf16>
    %c0_1 = arith.constant 0 : index
    %c0_2 = arith.constant 0 : index
    %1 = vector.load %arg2[%c0_1, %c0_2] : memref<1500x512xbf16, #tpu.memory_space<vmem>>, vector<1500x512xbf16>
    %cst = arith.constant dense<0.000000e+00> : vector<16x512xf32>
    %2 = tpu.matmul %0, %1, %cst {dimension_numbers = #tpu.dot_dimension_numbers<[1], [0], [0], [1], [0, 0, 1, 1], [], []>} : vector<16x1500xbf16>, vector<1500x512xbf16>, vector<16x512xf32> -> vector<16x512xf32>
    %c0_3 = arith.constant 0 : index
    %c0_4 = arith.constant 0 : index
    %3 = vector.load %arg3[%c0_3, %c0_4] : memref<1x512xf32, #tpu.memory_space<vmem>>, vector<1x512xf32>
    %4 = vector.broadcast %3 : vector<1x512xf32> to vector<16x512xf32>
    %5 = arith.addf %2, %4 : vector<16x512xf32>
    %c0_5 = arith.constant 0 : index
    %c0_6 = arith.constant 0 : index
    %6 = vector.load %arg4[%c0_5, %c0_6] : memref<16x512xf32, #tpu.memory_space<vmem>>, vector<16x512xf32>
    tpu.vector_store %arg4[%c0_5, %c0_6], %5 {strides = array<i32>} : memref<16x512xf32, #tpu.memory_space<vmem>>, vector<16x512xf32>,
    return
  }
  func.func @transform_0(%arg0: i32) -> (i32, i32) {
    %c0_i32 = arith.constant 0 : i32
    %c0_i32_0 = arith.constant 0 : i32
    return %arg0, %c0_i32 : i32, i32
  }
  func.func @transform_1(%arg0: i32) -> (i32, i32) {
    %c0_i32 = arith.constant 0 : i32
    %c0_i32_0 = arith.constant 0 : i32
    %c0_i32_1 = arith.constant 0 : i32
    return %c0_i32, %c0_i32_0 : i32, i32
  }
  func.func @transform_2(%arg0: i32) -> (i32, i32) {
    %c0_i32 = arith.constant 0 : i32
    %c0_i32_0 = arith.constant 0 : i32
    %c0_i32_1 = arith.constant 0 : i32
    return %c0_i32, %c0_i32_0 : i32, i32
  }
  func.func @transform_3(%arg0: i32) -> (i32, i32) {
    %c0_i32 = arith.constant 0 : i32
    %c0_i32_0 = arith.constant 0 : i32
    return %arg0, %c0_i32 : i32, i32
  }
}

module attributes {stable_mosaic.version = 11 : i64} {
  func.func @_bilstm_layer_kernel(%arg0: memref<8x2x512xf32, #tpu.memory_space<vmem>>, %arg1: memref<64x256xbf16, #tpu.memory_space<vmem>>, %arg2: memref<64x256xbf16, #tpu.memory_space<vmem>>, %arg3: memref<8x2x128xf32, #tpu.memory_space<vmem>>) attributes {dimension_semantics = [], scalar_prefetch = 0 : i64, scratch_operands = 0 : i64, tpu.core_type = #tpu.core_type<tc>} {
    %c0 = arith.constant 0 : index
    %c0_0 = arith.constant 0 : index
    %0 = vector.load %arg1[%c0, %c0_0] : memref<64x256xbf16, #tpu.memory_space<vmem>>, vector<64x256xbf16>
    %c0_1 = arith.constant 0 : index
    %c0_2 = arith.constant 0 : index
    %1 = vector.load %arg2[%c0_1, %c0_2] : memref<64x256xbf16, #tpu.memory_space<vmem>>, vector<64x256xbf16>
    %cst = arith.constant 0.000000e+00 : f32
    %2 = vector.broadcast %cst : f32 to vector<2x64xf32>
    %c0_i32 = arith.constant 0 : i32
    %c8_i32 = arith.constant 8 : i32
    %3 = arith.addi %c0_i32, %c8_i32 : i32
    %c1_i32 = arith.constant 1 : i32
    %4:4 = scf.for %arg4 = %c0_i32 to %3 step %c1_i32 iter_args(%arg5 = %2, %arg6 = %2, %arg7 = %2, %arg8 = %2) -> (vector<2x64xf32>, vector<2x64xf32>, vector<2x64xf32>, vector<2x64xf32>)  : i32 {
      %c7_i32 = arith.constant 7 : i32
      %5 = arith.subi %c7_i32, %arg4 : i32
      %6 = arith.index_cast %arg4 : i32 to index
      %c0_4 = arith.constant 0 : index
      %c0_5 = arith.constant 0 : index
      %7 = vector.load %arg0[%6, %c0_4, %c0_5] : memref<8x2x512xf32, #tpu.memory_space<vmem>>, vector<1x2x512xf32>
      %8 = vector.shape_cast %7 : vector<1x2x512xf32> to vector<2x512xf32>
      %9 = arith.index_cast %5 : i32 to index
      %c0_6 = arith.constant 0 : index
      %c0_7 = arith.constant 0 : index
      %10 = vector.load %arg0[%9, %c0_6, %c0_7] : memref<8x2x512xf32, #tpu.memory_space<vmem>>, vector<1x2x512xf32>
      %11 = vector.shape_cast %10 : vector<1x2x512xf32> to vector<2x512xf32>
      %12 = vector.extract_strided_slice %8 {offsets = [0, 0], sizes = [2, 256], strides = [1, 1]} : vector<2x512xf32> to vector<2x256xf32>
      %13 = arith.truncf %arg5 : vector<2x64xf32> to vector<2x64xbf16>
      %cst_8 = arith.constant dense<0.000000e+00> : vector<2x256xf32>
      %14 = tpu.matmul %13, %0, %cst_8 {dimension_numbers = #tpu.dot_dimension_numbers<[1], [0], [0], [1], [0, 0, 1, 1], [], []>} : vector<2x64xbf16>, vector<64x256xbf16>, vector<2x256xf32> -> vector<2x256xf32>
      %15 = arith.addf %12, %14 : vector<2x256xf32>
      %16 = vector.extract_strided_slice %11 {offsets = [0, 256], sizes = [2, 256], strides = [1, 1]} : vector<2x512xf32> to vector<2x256xf32>
      %17 = arith.truncf %arg7 : vector<2x64xf32> to vector<2x64xbf16>
      %cst_9 = arith.constant dense<0.000000e+00> : vector<2x256xf32>
      %18 = tpu.matmul %17, %1, %cst_9 {dimension_numbers = #tpu.dot_dimension_numbers<[1], [0], [0], [1], [0, 0, 1, 1], [], []>} : vector<2x64xbf16>, vector<64x256xbf16>, vector<2x256xf32> -> vector<2x256xf32>
      %19 = arith.addf %16, %18 : vector<2x256xf32>
      %20 = arith.negf %15 : vector<2x256xf32>
      %21 = math.exp %20 : vector<2x256xf32>
      %cst_10 = arith.constant 1.000000e+00 : f32
      %22 = vector.broadcast %cst_10 : f32 to vector<2x256xf32>
      %23 = arith.addf %22, %21 : vector<2x256xf32>
      %24 = arith.divf %22, %23 : vector<2x256xf32>
      %25 = math.tanh %15 : vector<2x256xf32>
      %26 = arith.negf %19 : vector<2x256xf32>
      %27 = math.exp %26 : vector<2x256xf32>
      %cst_11 = arith.constant 1.000000e+00 : f32
      %28 = vector.broadcast %cst_11 : f32 to vector<2x256xf32>
      %29 = arith.addf %28, %27 : vector<2x256xf32>
      %30 = arith.divf %28, %29 : vector<2x256xf32>
      %31 = math.tanh %19 : vector<2x256xf32>
      %32 = vector.extract_strided_slice %24 {offsets = [0, 64], sizes = [2, 64], strides = [1, 1]} : vector<2x256xf32> to vector<2x64xf32>
      %33 = arith.mulf %32, %arg6 : vector<2x64xf32>
      %34 = vector.extract_strided_slice %24 {offsets = [0, 0], sizes = [2, 64], strides = [1, 1]} : vector<2x256xf32> to vector<2x64xf32>
      %35 = vector.extract_strided_slice %25 {offsets = [0, 128], sizes = [2, 64], strides = [1, 1]} : vector<2x256xf32> to vector<2x64xf32>
      %36 = arith.mulf %34, %35 : vector<2x64xf32>
      %37 = arith.addf %33, %36 : vector<2x64xf32>
      %38 = vector.extract_strided_slice %24 {offsets = [0, 192], sizes = [2, 64], strides = [1, 1]} : vector<2x256xf32> to vector<2x64xf32>
      %39 = math.tanh %37 : vector<2x64xf32>
      %40 = arith.mulf %38, %39 : vector<2x64xf32>
      %41 = vector.extract_strided_slice %30 {offsets = [0, 64], sizes = [2, 64], strides = [1, 1]} : vector<2x256xf32> to vector<2x64xf32>
      %42 = arith.mulf %41, %arg8 : vector<2x64xf32>
      %43 = vector.extract_strided_slice %30 {offsets = [0, 0], sizes = [2, 64], strides = [1, 1]} : vector<2x256xf32> to vector<2x64xf32>
      %44 = vector.extract_strided_slice %31 {offsets = [0, 128], sizes = [2, 64], strides = [1, 1]} : vector<2x256xf32> to vector<2x64xf32>
      %45 = arith.mulf %43, %44 : vector<2x64xf32>
      %46 = arith.addf %42, %45 : vector<2x64xf32>
      %47 = vector.extract_strided_slice %30 {offsets = [0, 192], sizes = [2, 64], strides = [1, 1]} : vector<2x256xf32> to vector<2x64xf32>
      %48 = math.tanh %46 : vector<2x64xf32>
      %49 = arith.mulf %47, %48 : vector<2x64xf32>
      %50 = vector.shape_cast %40 : vector<2x64xf32> to vector<1x2x64xf32>
      %51 = arith.index_cast %arg4 : i32 to index
      %c0_12 = arith.constant 0 : index
      %c0_13 = arith.constant 0 : index
      %52 = vector.load %arg3[%51, %c0_12, %c0_13] : memref<8x2x128xf32, #tpu.memory_space<vmem>>, vector<1x2x64xf32>
      tpu.vector_store %arg3[%51, %c0_12, %c0_13], %50 {strides = array<i32>} : memref<8x2x128xf32, #tpu.memory_space<vmem>>, vector<1x2x64xf32>,
      %53 = vector.shape_cast %49 : vector<2x64xf32> to vector<1x2x64xf32>
      %54 = arith.index_cast %5 : i32 to index
      %c0_14 = arith.constant 0 : index
      %c64 = arith.constant 64 : index
      %55 = vector.load %arg3[%54, %c0_14, %c64] : memref<8x2x128xf32, #tpu.memory_space<vmem>>, vector<1x2x64xf32>
      tpu.vector_store %arg3[%54, %c0_14, %c64], %53 {strides = array<i32>} : memref<8x2x128xf32, #tpu.memory_space<vmem>>, vector<1x2x64xf32>,
      scf.yield %40, %37, %49, %46 : vector<2x64xf32>, vector<2x64xf32>, vector<2x64xf32>, vector<2x64xf32>
    }
    %c8_i32_3 = arith.constant 8 : i32
    return
  }
}

module attributes {stable_mosaic.version = 11 : i64} {
  func.func @_proj_kernel(%arg0: i32, %arg1: memref<16x128xbf16, #tpu.memory_space<vmem>>, %arg2: memref<128x512xbf16, #tpu.memory_space<vmem>>, %arg3: memref<1x512xf32, #tpu.memory_space<vmem>>, %arg4: memref<16x512xf32, #tpu.memory_space<vmem>>) attributes {dimension_semantics = [#tpu.dimension_semantics<parallel>], iteration_bounds = array<i64: 1>, scalar_prefetch = 0 : i64, scratch_operands = 0 : i64, tpu.core_type = #tpu.core_type<tc>, window_params = [{transform_indices = @transform_0, window_bounds = array<i64: 16, 128>}, {pipeline_mode = #tpu.pipeline_mode<synchronous>, transform_indices = @transform_1, window_bounds = array<i64: 128, 512>}, {pipeline_mode = #tpu.pipeline_mode<synchronous>, transform_indices = @transform_2, window_bounds = array<i64: 1, 512>}, {transform_indices = @transform_3, window_bounds = array<i64: 16, 512>}]} {
    %c0 = arith.constant 0 : index
    %c0_0 = arith.constant 0 : index
    %0 = vector.load %arg1[%c0, %c0_0] : memref<16x128xbf16, #tpu.memory_space<vmem>>, vector<16x128xbf16>
    %c0_1 = arith.constant 0 : index
    %c0_2 = arith.constant 0 : index
    %1 = vector.load %arg2[%c0_1, %c0_2] : memref<128x512xbf16, #tpu.memory_space<vmem>>, vector<128x512xbf16>
    %cst = arith.constant dense<0.000000e+00> : vector<16x512xf32>
    %2 = tpu.matmul %0, %1, %cst {dimension_numbers = #tpu.dot_dimension_numbers<[1], [0], [0], [1], [0, 0, 1, 1], [], []>} : vector<16x128xbf16>, vector<128x512xbf16>, vector<16x512xf32> -> vector<16x512xf32>
    %c0_3 = arith.constant 0 : index
    %c0_4 = arith.constant 0 : index
    %3 = vector.load %arg3[%c0_3, %c0_4] : memref<1x512xf32, #tpu.memory_space<vmem>>, vector<1x512xf32>
    %4 = vector.broadcast %3 : vector<1x512xf32> to vector<16x512xf32>
    %5 = arith.addf %2, %4 : vector<16x512xf32>
    %c0_5 = arith.constant 0 : index
    %c0_6 = arith.constant 0 : index
    %6 = vector.load %arg4[%c0_5, %c0_6] : memref<16x512xf32, #tpu.memory_space<vmem>>, vector<16x512xf32>
    tpu.vector_store %arg4[%c0_5, %c0_6], %5 {strides = array<i32>} : memref<16x512xf32, #tpu.memory_space<vmem>>, vector<16x512xf32>,
    return
  }
  func.func @transform_0(%arg0: i32) -> (i32, i32) {
    %c0_i32 = arith.constant 0 : i32
    %c0_i32_0 = arith.constant 0 : i32
    return %arg0, %c0_i32 : i32, i32
  }
  func.func @transform_1(%arg0: i32) -> (i32, i32) {
    %c0_i32 = arith.constant 0 : i32
    %c0_i32_0 = arith.constant 0 : i32
    %c0_i32_1 = arith.constant 0 : i32
    return %c0_i32, %c0_i32_0 : i32, i32
  }
  func.func @transform_2(%arg0: i32) -> (i32, i32) {
    %c0_i32 = arith.constant 0 : i32
    %c0_i32_0 = arith.constant 0 : i32
    %c0_i32_1 = arith.constant 0 : i32
    return %c0_i32, %c0_i32_0 : i32, i32
  }
  func.func @transform_3(%arg0: i32) -> (i32, i32) {
    %c0_i32 = arith.constant 0 : i32
    %c0_i32_0 = arith.constant 0 : i32
    return %arg0, %c0_i32 : i32, i32
  }
}

</mosaic_0001>

<bundles_post_ra>
// kernel: bilstm_forward.7
= control target key start
LH: loop header
LB: loop body
LE: loop exit
PB: predicated region body
PF: predicated region fallthrough
CT: control target
= control target key end

     0   :  { %v582_v16 = vmov 0.0   ;;  %v584_v17 = vmov 0.0   ;;  %v586_v18 = vmov 0.0   ;;  %v588_v19 = vmov 0.0   ;;  %s590_s16 = smov 0   ;;  %s679_s0 = inlined_call_operand.vmem [shape: f32[8,2,512], index: 0, kind: input, shape index: {}]   ;;  %s680_s1 = inlined_call_operand.vmem [shape: bf16[64,256], index: 1, kind: input, shape index: {}]   ;;  %s681_s2 = inlined_call_operand.vmem [shape: bf16[64,256], index: 2, kind: input, shape index: {}]   ;;  %s682_s3 = inlined_call_operand.vmem [shape: f32[8,2,128], index: 3, kind: output, shape index: {}]  }
   0x1   :  { %v505_v0 = vld [vmem:[%s680_s1] sm:$0xff]  ;;  %v510_v1 = vld [vmem:[%s680_s1 + $0x8] sm:$0xff]  ;;  %v515_v2 = vld [vmem:[%s680_s1 + $0x10] sm:$0xff] }
   0x2   :  { %v520_v3 = vld [vmem:[%s680_s1 + $0x18] sm:$0xff]  ;;  %v525_v4 = vld [vmem:[%s680_s1 + $0x20] sm:$0xff]  ;;  %v530_v5 = vld [vmem:[%s680_s1 + $0x28] sm:$0xff] }
   0x3   :  { %v535_v6 = vld [vmem:[%s680_s1 + $0x30] sm:$0xff]  ;;  %v540_v7 = vld [vmem:[%s680_s1 + $0x38] sm:$0xff]  ;;  %v545_v8 = vld [vmem:[%s681_s2] sm:$0xff] }
   0x4   :  { %v550_v9 = vld [vmem:[%s681_s2 + $0x8] sm:$0xff]  ;;  %v555_v10 = vld [vmem:[%s681_s2 + $0x10] sm:$0xff]  ;;  %v560_v11 = vld [vmem:[%s681_s2 + $0x18] sm:$0xff] }
   0x5   :  { %v565_v12 = vld [vmem:[%s681_s2 + $0x20] sm:$0xff]  ;;  %v570_v13 = vld [vmem:[%s681_s2 + $0x28] sm:$0xff]  ;;  %v575_v14 = vld [vmem:[%s681_s2 + $0x30] sm:$0xff] }
   0x6   :  { %v580_v15 = vld [vmem:[%s681_s2 + $0x38] sm:$0xff] }
   0x7 LB: > { %v366_v20 = vcombine.high %v545_v8, %v550_v9  ;;  %v365_v21 = vcombine.low %v545_v8, %v550_v9  ;;  %v357_v22 = vcombine.high %v505_v0, %v510_v1  ;;  %v368_v23 = vcombine.high %v555_v10, %v560_v11  ;;  %s41_s2 = ssub.s32 7, %s477_s16  ;;  %s378_s21 = sshll.u32 %s477_s16, 3  ;;  %s477_s16 = sphi %s590_s16, %s36_s16   ;;  %v473_v19 = vphi %v588_v19, %v282_v19   ;;  %v469_v18 = vphi %v586_v18, %v271_v18   ;;  %v465_v17 = vphi %v584_v17, %v303_v17   ;;  %v461_v16 = vphi %v582_v16, %v292_v16  }
   0x8   : > { %v356_v24 = vcombine.low %v505_v0, %v510_v1  ;;  %v359_v25 = vcombine.high %v515_v2, %v520_v3  ;;  %v367_v26 = vcombine.low %v555_v10, %v560_v11  ;;  %v358_v27 = vcombine.low %v515_v2, %v520_v3  ;;  %s379_s17 = sshll.u32 %s41_s2, 3  ;;  %s44_s24 = scalar_lea.vmem %s679_s0, %s378_s21 }
   0x9   : > { %192 = vmatprep.subr.bf16.mxu1 %v366_v20  ;;  %95 = vmatprep.subr.bf16.mxu0 %v357_v22  ;;  %v370_v28 = vcombine.high %v565_v12, %v570_v13  ;;  %v361_v29 = vcombine.high %v525_v4, %v530_v5  ;;  %v479_v30 = vmov 0   ;;  %v369_v31 = vcombine.low %v565_v12, %v570_v13  ;;  %s48_s20 = scalar_lea.vmem %s679_s0, %s379_s17  ;;  %v45_v56 = vld [vmem:[%s44_s24] sm:$0xff]  ;;  %s481_s25 = smov 64  }
   0xa   : > { %193 = vmatpush1.bf16.msra.mxu1 %v365_v21  ;;  %96 = vmatpush1.bf16.msra.mxu0 %v356_v24  ;;  %v360_v32 = vcombine.low %v525_v4, %v530_v5  ;;  %v372_v33 = vcombine.high %v575_v14, %v580_v15  ;;  %v363_v34 = vcombine.high %v535_v6, %v540_v7  ;;  %vm91_vm0 = vcmask 523264   ;;  %v49_v44 = vld [vmem:[%s48_s20] sm:$0xff]  ;;  %s376_s26 = sshll.u32 %s477_s16, 1  ;;  %s377_s30 = sshll.u32 %s41_s2, 1 }
   0xb   : > { %194 = vmatprep.subr.bf16.mxu1 %v368_v23  ;;  %97 = vmatprep.subr.bf16.mxu0 %v359_v25  ;;  %v371_v35 = vcombine.low %v575_v14, %v580_v15  ;;  %v362_v36 = vcombine.low %v535_v6, %v540_v7  ;;  %v148_v37 = vpack.c.bf16 %v465_v17, %v465_v17  ;;  %v480_v39 = vmov 1983009808   ;;  %s305_s29 = scalar_lea.vmem %s682_s3, %s376_s26  ;;  %s320_s6 = scalar_lea.vmem %s682_s3, %s377_s30 }
   0xc   : > { %224 = vmatprep.mubr.bf16.mxu1 %v479_v30  ;;  %127 = vmatprep.mubr.bf16.mxu0 %v479_v30  ;;  %v50_v38 = vpack.c.bf16 %v473_v19, %v473_v19  ;;  %v140_v40 = vunpack.c.l.s4 %v480_v39  ;;  %v142_v41 = vlaneseq  ;;  %v234_v50 = vrot.slane %v49_v44, 4  ;;  %s36_s16 = sadd.s32 1, %s477_s16  }
   0xd   : > { %vm306_vm1 = vcmask 517120   ;;  %vm321_vm2 = vcmask 1041920   ;;  %p33_p0 = scmp.ge.s32.totalorder %s36_s16, 8  }
   0xe   : > { %195 = vmatpush1.bf16.msra.mxu1 %v367_v26  ;;  %98 = vmatpush1.bf16.msra.mxu0 %v358_v27  ;;  %v141_v42 = vunpack.c.0.s8 %v140_v40  ;;  %v143_v43 = vshrl.u32 %v142_v41, 7 }
   0xf   : > { %196 = vmatprep.subr.bf16.mxu1 %v370_v28  ;;  %99 = vmatprep.subr.bf16.mxu0 %v361_v29 }
  0x10   : > { %v642_v46 = vsub.s32 %v141_v42, %v143_v43 }
  0x12   : > { %197 = vmatpush1.bf16.msra.mxu1 %v369_v31  ;;  %100 = vmatpush1.bf16.msra.mxu0 %v360_v32 }
  0x13   : > { %198 = vmatprep.subr.bf16.mxu1 %v372_v33  ;;  %101 = vmatprep.subr.bf16.mxu0 %v363_v34 }
  0x16   : > { %199 = vmatpush1.bf16.msra.mxu1 %v371_v35  ;;  %102 = vmatpush1.bf16.msra.mxu0 %v362_v36 }
  0x19   : > { %373 = vmatmul.mubr.msk.bf16.vlgmr.msra.gmra.mrb[0].mxu1 %vm91_vm0, %v148_v37  ;;  %364 = vmatmul.mubr.msk.bf16.vlgmr.msra.gmra.mrb[0].mxu0 %vm91_vm0, %v50_v38 }
  0xec   : > { %v226_v45 = vpop.f32.mrb[0].mxu1  ;;  %v129_v47 = vpop.f32.mrb[0].mxu0 }
  0xed   : > { %v228_v48 = vpop.f32.mrb[1].mxu1  ;;  %v131_v49 = vpop.f32.mrb[1].mxu0 }
  0xee   : > { %v238_v51 = vcombine.low %v226_v45, %v228_v48  ;;  %v230_v52 = vpop.f32.mrb[2].mxu1  ;;  %v138_v53 = vcombine.low %v129_v47, %v131_v49  ;;  %v133_v54 = vpop.f32.mrb[2].mxu0 }
  0xef   : > { %v231_v55 = vpop.f32.mrb[3].mxu1  ;;  %v134_v57 = vpop.f32.mrb[3].mxu0 }
  0xf0   : > { %v245_v58 = vrot.slane %v238_v51, %v642_v46  ;;  %v145_v59 = vrot.slane %v138_v53, %v642_v46 }
  0xf2   : > { %v247_v60 = vadd.f32 %v245_v58, %v234_v50  ;;  %v147_v61 = vadd.f32 %v145_v59, %v45_v56 }
  0xf4   : > { %v375_v62 = vmul.f32 -1.442695, %v247_v60  ;;  %v374_v63 = vmul.f32 -1.442695, %v147_v61 }
  0xf6   : > { %423 = vpow2.f32 %v375_v62 }
  0xf7   : > { %425 = vpow2.f32 %v374_v63 }
  0xf8   : > { %427 = vtanh.f32 %v147_v61 }
  0xf9   : > { %429 = vtanh.f32 %v247_v60 }
 0x100   : > { %v424_v17 = vpop.eup %423 }
 0x101   : > { %v426_v19 = vpop.eup %425  ;;  %v258_v20 = vadd.f32 1.0, %v424_v17 }
 0x102   : > { %v251_v21 = vadd.f32 1.0, %v426_v19  ;;  %v428_v22 = vpop.eup %427 }
 0x103   : > { %431 = vrcp.f32 %v258_v20  ;;  %v430_v23 = vpop.eup %429  ;;  %v264_v25 = vrot.slane %v428_v22, 2 }
 0x104   : > { %433 = vrcp.f32 %v251_v21  ;;  %v285_v24 = vrot.slane %v430_v23, 2 }
 0x10d   : > { %v432_v26 = vpop.eup %431 }
 0x10e   : > { %v434_v27 = vpop.eup %433  ;;  %295 = vrot.lane.b32.xlu1 %v432_v26, %s481_s25  ;;  %v287_v28 = vmul.f32 %v432_v26, %v285_v24  ;;  %v283_v30 = vmul.f32 %v461_v16, %v432_v26 }
 0x10f   : > { %v266_v29 = vmul.f32 %v434_v27, %v264_v25  ;;  %v262_v32 = vmul.f32 %v469_v18, %v434_v27 }
 0x110   : > { %289 = vrot.lane.b32.xlu0 %v287_v28, %s481_s25 }
 0x114   : > { %268 = vrot.lane.b32.xlu0 %v266_v29, %s481_s25 }
 0x118   : > { %274 = vrot.lane.b32.xlu0 %v434_v27, %s481_s25 }
 0x180   : > { %v296_v36 = vpop.permute.xlu1 %295 }
 0x181   : > { %v297_v37 = vrot.slane %v296_v36, 2 }
 0x182   : > { %v290_v31 = vpop.permute.xlu0 %289 }
 0x183   : > { %v292_v16 = vadd.f32 %v290_v31, %v283_v30  }
 0x185   : > { %435 = vtanh.f32 %v292_v16 }
 0x186   : > { %v269_v33 = vpop.permute.xlu0 %268 }
 0x187   : > { %v271_v18 = vadd.f32 %v269_v33, %v262_v32  }
 0x189   : > { %437 = vtanh.f32 %v271_v18 }
 0x18a   : > { %v275_v38 = vpop.permute.xlu0 %274 }
 0x18b   : > { %v276_v40 = vrot.slane %v275_v38, 2 }
 0x18f   : > { %v436_v34 = vpop.eup %435 }
 0x190   : > { %300 = vrot.lane.b32.xlu1 %v436_v34, %s481_s25 }
 0x193   : > { %v438_v35 = vpop.eup %437 }
 0x194   : > { %279 = vrot.lane.b32.xlu1 %v438_v35, %s481_s25 }
 0x202   : > { %v301_v39 = vpop.permute.xlu1 %300 }
 0x203   : > { %v303_v17 = vmul.f32 %v301_v39, %v297_v37  }
 0x205   : > { %v315_v41 = vrot.slane %v303_v17, %v642_v46 }
 0x206   : > { %v280_v42 = vpop.permute.xlu1 %279 }
 0x207   : > { %v282_v19 = vmul.f32 %v280_v42, %v276_v40   ;;  %316 = vrot.lane.b32.xlu0 %v315_v41, %s481_s25 }
 0x209   : > { %307 = vst.msk [vmem:[%s305_s29] sm:$0x3] %vm306_vm1, %v282_v19 }
 0x274   :  { %35 = sbr.rel (!%p33_p0) target bundleno = 7 (0x7), region = 43 }
 0x279   : > { %v317_v43 = vpop.permute.xlu0 %316 }
 0x27a   : > { %322 = vst.msk [vmem:[%s320_s6] sm:$0x3] %vm321_vm2, %v317_v43 }

// kernel: bilstm_forward.8
= control target key start
LH: loop header
LB: loop body
LE: loop exit
PB: predicated region body
PF: predicated region fallthrough
CT: control target
= control target key end

     0   :  { %v418_v1 = vmov 0   ;;  %v51_v34 = vlaneseq  ;;  %s565_s1 = inlined_call_operand.vmem [shape: bf16[128,512], index: 1, kind: input, shape index: {}]   ;;  %s566_s0 = inlined_call_operand.vmem [shape: bf16[16,128], index: 0, kind: input, shape index: {}]   ;;  %s567_s2 = inlined_call_operand.vmem [shape: f32[1,512], index: 2, kind: input, shape index: {}]   ;;  %s568_s3 = inlined_call_operand.vmem [shape: f32[16,512], index: 3, kind: output, shape index: {}]  }
   0x1   :  { %v369_v0 = vld [vmem:[%s565_s1 + $0x4] ss:$16 sps:$4 sm:$0xff]   ;;  %269 = vmatprep.mubr.bf16.mxu0 %v418_v1  ;;  %312 = vmatprep.mubr.bf16.mxu1 %v418_v1  ;;  %v371_v2 = vld [vmem:[%s565_s1 + $0xc] ss:$16 sps:$4 sm:$0xff]   ;;  %v373_v3 = vld [vmem:[%s565_s1] ss:$16 sps:$4 sm:$0xff]  }
   0x2   :  { %237 = vmatprep.subr.bf16.mxu0 %v369_v0  ;;  %v374_v4 = vld [vmem:[%s565_s1 + $0x8] ss:$16 sps:$4 sm:$0xff]   ;;  %280 = vmatprep.subr.bf16.mxu1 %v371_v2  ;;  %v375_v5 = vld [vmem:[%s565_s1 + $0x24] ss:$16 sps:$4 sm:$0xff]   ;;  %v377_v6 = vld [vmem:[%s565_s1 + $0x2c] ss:$16 sps:$4 sm:$0xff]  }
   0x3   :  { %238 = vmatpush1.bf16.msra.mxu0 %v373_v3  ;;  %281 = vmatpush1.bf16.msra.mxu1 %v374_v4  ;;  %v379_v7 = vld [vmem:[%s565_s1 + $0x20] ss:$16 sps:$4 sm:$0xff]   ;;  %v380_v8 = vld [vmem:[%s565_s1 + $0x28] ss:$16 sps:$4 sm:$0xff]   ;;  %v381_v9 = vld [vmem:[%s565_s1 + $0x44] ss:$16 sps:$4 sm:$0xff]  }
   0x4   :  { %239 = vmatprep.subr.bf16.mxu0 %v375_v5  ;;  %282 = vmatprep.subr.bf16.mxu1 %v377_v6  ;;  %v383_v10 = vld [vmem:[%s565_s1 + $0x4c] ss:$16 sps:$4 sm:$0xff]   ;;  %v385_v11 = vld [vmem:[%s565_s1 + $0x40] ss:$16 sps:$4 sm:$0xff]   ;;  %v386_v12 = vld [vmem:[%s565_s1 + $0x48] ss:$16 sps:$4 sm:$0xff]  }
   0x5   :  { %v387_v13 = vld [vmem:[%s565_s1 + $0x64] ss:$16 sps:$4 sm:$0xff]   ;;  %v389_v14 = vld [vmem:[%s565_s1 + $0x6c] ss:$16 sps:$4 sm:$0xff]   ;;  %v391_v15 = vld [vmem:[%s565_s1 + $0x60] ss:$16 sps:$4 sm:$0xff]  }
   0x6   :  { %v392_v16 = vld [vmem:[%s565_s1 + $0x68] ss:$16 sps:$4 sm:$0xff]   ;;  %v393_v17 = vld [vmem:[%s565_s1 + $0x84] ss:$16 sps:$4 sm:$0xff]   ;;  %v395_v18 = vld [vmem:[%s565_s1 + $0x8c] ss:$16 sps:$4 sm:$0xff]  }
   0x7   :  { %240 = vmatpush1.bf16.msra.mxu0 %v379_v7  ;;  %283 = vmatpush1.bf16.msra.mxu1 %v380_v8  ;;  %v397_v19 = vld [vmem:[%s565_s1 + $0x80] ss:$16 sps:$4 sm:$0xff]   ;;  %v398_v20 = vld [vmem:[%s565_s1 + $0x88] ss:$16 sps:$4 sm:$0xff]   ;;  %v399_v21 = vld [vmem:[%s565_s1 + $0xa4] ss:$16 sps:$4 sm:$0xff]  }
   0x8   :  { %241 = vmatprep.subr.bf16.mxu0 %v381_v9  ;;  %284 = vmatprep.subr.bf16.mxu1 %v383_v10  ;;  %v401_v22 = vld [vmem:[%s565_s1 + $0xac] ss:$16 sps:$4 sm:$0xff]   ;;  %v403_v23 = vld [vmem:[%s565_s1 + $0xa0] ss:$16 sps:$4 sm:$0xff]   ;;  %v404_v24 = vld [vmem:[%s565_s1 + $0xa8] ss:$16 sps:$4 sm:$0xff]  }
   0x9   :  { %v405_v25 = vld [vmem:[%s565_s1 + $0xc4] ss:$16 sps:$4 sm:$0xff]   ;;  %v407_v26 = vld [vmem:[%s565_s1 + $0xcc] ss:$16 sps:$4 sm:$0xff]   ;;  %v409_v27 = vld [vmem:[%s565_s1 + $0xc0] ss:$16 sps:$4 sm:$0xff]  }
   0xa   :  { %v410_v28 = vld [vmem:[%s565_s1 + $0xc8] ss:$16 sps:$4 sm:$0xff]   ;;  %v411_v29 = vld [vmem:[%s565_s1 + $0xe4] ss:$16 sps:$4 sm:$0xff]   ;;  %v413_v30 = vld [vmem:[%s565_s1 + $0xec] ss:$16 sps:$4 sm:$0xff]  }
   0xb   :  { %242 = vmatpush1.bf16.msra.mxu0 %v385_v11  ;;  %285 = vmatpush1.bf16.msra.mxu1 %v386_v12  ;;  %v415_v31 = vld [vmem:[%s565_s1 + $0xe0] ss:$16 sps:$4 sm:$0xff]   ;;  %v416_v32 = vld [vmem:[%s565_s1 + $0xe8] ss:$16 sps:$4 sm:$0xff]   ;;  %v52_v35 = vshrl.u32 %v51_v34, 7 }
   0xc   :  { %243 = vmatprep.subr.bf16.mxu0 %v387_v13  ;;  %286 = vmatprep.subr.bf16.mxu1 %v389_v14  ;;  %v417_v33 = vld [vmem:[%s566_s0] sm:$0xff]  }
   0xd   :  { %v53_v36 = vsub.s32 0, %v52_v35  ;;  %v61_v37 = vsub.s32 2, %v52_v35  ;;  %v49_v38 = vld [vmem:[%s567_s2] sm:$0xf]  ;;  %v57_v39 = vsub.s32 1, %v52_v35  ;;  %v65_v40 = vsub.s32 3, %v52_v35 }
   0xf   :  { %244 = vmatpush1.bf16.msra.mxu0 %v391_v15  ;;  %287 = vmatpush1.bf16.msra.mxu1 %v392_v16  ;;  %v54_v41 = vrot.slane %v49_v38, %v53_v36  ;;  %v62_v42 = vrot.slane %v49_v38, %v61_v37  ;;  %v58_v43 = vrot.slane %v49_v38, %v57_v39 }
  0x10   :  { %245 = vmatprep.subr.bf16.mxu0 %v393_v17  ;;  %288 = vmatprep.subr.bf16.mxu1 %v395_v18  ;;  %v66_v44 = vrot.slane %v49_v38, %v65_v40 }
  0x13   :  { %246 = vmatpush1.bf16.msra.mxu0 %v397_v19  ;;  %289 = vmatpush1.bf16.msra.mxu1 %v398_v20 }
  0x14   :  { %247 = vmatprep.subr.bf16.mxu0 %v399_v21  ;;  %290 = vmatprep.subr.bf16.mxu1 %v401_v22 }
  0x17   :  { %248 = vmatpush1.bf16.msra.mxu0 %v403_v23  ;;  %291 = vmatpush1.bf16.msra.mxu1 %v404_v24 }
  0x18   :  { %249 = vmatprep.subr.bf16.mxu0 %v405_v25  ;;  %292 = vmatprep.subr.bf16.mxu1 %v407_v26 }
  0x1b   :  { %250 = vmatpush1.bf16.msra.mxu0 %v409_v27  ;;  %293 = vmatpush1.bf16.msra.mxu1 %v410_v28 }
  0x1c   :  { %251 = vmatprep.subr.bf16.mxu0 %v411_v29  ;;  %294 = vmatprep.subr.bf16.mxu1 %v413_v30 }
  0x1f   :  { %252 = vmatpush1.bf16.msra.mxu0 %v415_v31  ;;  %295 = vmatpush1.bf16.msra.mxu1 %v416_v32 }
  0x22   :  { %270 = vmatmul.mubr.bf16.vlgmr.msra.gmra.mrb[0].mxu0 %v417_v33  ;;  %313 = vmatmul.mubr.bf16.vlgmr.msra.gmra.mrb[0].mxu1 %v417_v33 }
  0xf5   :  { %v271_v45 = vpop.f32.mrb[0].mxu0  ;;  %v314_v46 = vpop.f32.mrb[0].mxu1 }
  0xf6   :  { %v272_v47 = vadd.f32 %v271_v45, %v54_v41  ;;  %v315_v48 = vadd.f32 %v314_v46, %v62_v42  ;;  %v273_v49 = vpop.f32.mrb[1].mxu0  ;;  %v316_v50 = vpop.f32.mrb[1].mxu1 }
  0xf7   :  { %v274_v51 = vadd.f32 %v273_v49, %v58_v43  ;;  %v317_v52 = vadd.f32 %v316_v50, %v66_v44  ;;  %v275_v53 = vpop.f32.mrb[2].mxu0  ;;  %v318_v54 = vpop.f32.mrb[2].mxu1 }
  0xf8   :  { %323 = vst [vmem:[%s568_s3] sm:$0xff] %v272_v47  ;;  %325 = vst [vmem:[%s568_s3 + $0x10] sm:$0xff] %v315_v48  ;;  %v276_v55 = vadd.f32 %v275_v53, %v54_v41  ;;  %v319_v56 = vadd.f32 %v318_v54, %v62_v42  ;;  %v277_v57 = vpop.f32.mrb[3].mxu0  ;;  %v320_v58 = vpop.f32.mrb[3].mxu1 }
  0xf9   :  { %324 = vst [vmem:[%s568_s3 + $0x8] sm:$0xff] %v274_v51  ;;  %326 = vst [vmem:[%s568_s3 + $0x18] sm:$0xff] %v317_v52  ;;  %v278_v59 = vadd.f32 %v277_v57, %v58_v43  ;;  %v321_v60 = vadd.f32 %v320_v58, %v66_v44 }
  0xfa   :  { %327 = vst [vmem:[%s568_s3 + $0x20] sm:$0xff] %v276_v55  ;;  %329 = vst [vmem:[%s568_s3 + $0x30] sm:$0xff] %v319_v56 }
  0xfb   :  { %328 = vst [vmem:[%s568_s3 + $0x28] sm:$0xff] %v278_v59  ;;  %330 = vst [vmem:[%s568_s3 + $0x38] sm:$0xff] %v321_v60 }

// kernel: bilstm_forward.6
= control target key start
LH: loop header
LB: loop body
LE: loop exit
PB: predicated region body
PF: predicated region fallthrough
CT: control target
= control target key end

     0   :  { %8 = vsyncpa [#allocation3], 0  ;;  %s4115_s0 = inlined_call_operand.vmem [shape: bf16[16,1500], index: 0, kind: input, shape index: {}]   ;;  %s4116_s1 = inlined_call_operand.hbm [shape: bf16[1500,512], index: 1, kind: input, shape index: {}]   ;;  %s4117_s2 = inlined_call_operand.hbm [shape: f32[1,512], index: 2, kind: input, shape index: {}]   ;;  %s4118_s3 = inlined_call_operand.vmem [shape: f32[16,512], index: 3, kind: output, shape index: {}]  }
   0x1   :  { %9 = vsyncpa [#allocation5], 0  ;;  %s4007_s12 = smov [#allocation2]   ;;  %s3959_s16 = scalar_lea.hbm %s4116_s1, 48128 }
   0x2   :  { %s17_s13 = sshll.u32 %s4007_s12, 4  ;;  %p3960_p0 = scmp.ne.s32.totalorder %s4116_s1, %s3959_s16  ;;  %s18_s13 = int_to_ptr.vmem [resolvable:$true] %s17_s13 }
   0x3   :  { %p3963_p1 = scmp.lt.u32.totalorder %s3959_s16, %s4116_s1 }
   0x5   :  { %p3965_p2 = pnand %p3963_p1, %p3960_p0 }
   0x7   :  { %3968 = shalt.err (!%p3965_p2)
}
   0x8   :  { %s3969_s21 = scalar_lea.vmem %s18_s13, 48128  ;;  %p3974_p4 = scmp.lt.s32.totalorder %s18_s13, %s18_s13 }
   0x9   :  { %p3970_p3 = scmp.ne.s32.totalorder %s18_s13, %s3969_s21  ;;  %p3975_p5 = scmp.lt.s32.totalorder %s3969_s21, %s3969_s21 }
   0xb   :  { %p3976_p6 = por %p3975_p5, %p3974_p4 }
   0xd   :  { %p3977_p7 = pnand %p3976_p6, %p3970_p3 }
   0xf   :  { %3980 = shalt.err (!%p3977_p7)
}
  0x10   :  { %s4008_s22 = smov 256   ;;  %s4009_s23 = smov 16  }
  0x11   :  { %23 = dma.hbm_to_vmem [thread:$0]  %s4116_s1, 48128, %s18_s13, [#allocation3], %s4008_s22, %s4008_s22, %s4009_s23  }
  0x12   :  { %s4010_s26 = smov [#allocation4]   ;;  %s3981_s30 = scalar_lea.hbm %s4117_s2, 64 }
  0x13   :  { %s30_s27 = sshll.u32 %s4010_s26, 4  ;;  %p3982_p8 = scmp.ne.s32.totalorder %s4117_s2, %s3981_s30  ;;  %s31_s27 = int_to_ptr.vmem [resolvable:$true] %s30_s27 }
  0x14   :  { %p3985_p9 = scmp.lt.u32.totalorder %s3981_s30, %s4117_s2 }
  0x16   :  { %p3987_p10 = pnand %p3985_p9, %p3982_p8 }
  0x18   :  { %3990 = shalt.err (!%p3987_p10)
}
  0x19   :  { %s3991_s8 = scalar_lea.vmem %s31_s27, 64  ;;  %p3996_p12 = scmp.lt.s32.totalorder %s31_s27, %s31_s27 }
  0x1a   :  { %p3992_p11 = scmp.ne.s32.totalorder %s31_s27, %s3991_s8  ;;  %p3997_p13 = scmp.lt.s32.totalorder %s3991_s8, %s3991_s8 }
  0x1c   :  { %p3998_p0 = por %p3997_p13, %p3996_p12 }
  0x1e   :  { %p3999_p1 = pnand %p3998_p0, %p3992_p11 }
  0x20   :  { %4002 = shalt.err (!%p3999_p1)
}
  0x21   :  { %33 = dma.hbm_to_vmem [thread:$0]  %s4117_s2, 64, %s31_s27, [#allocation5]  }
  0x22   :  { %4003 = dma.done.wait [#allocation3], 48128  }
  0x23   :  { %4004 = vsyncadd [#allocation3], 4294919168 }
  0x24   :  { %4005 = dma.done.wait [#allocation5], 64  }
  0x25   :  { %4006 = vsyncadd [#allocation5], 4294967232  ;;  %v3377_v0 = vld [vmem:[#allocation2 + $0x4] ss:$16 sps:$4 sm:$0xff]   ;;  %v3379_v1 = vld [vmem:[#allocation2 + $0xc] ss:$16 sps:$4 sm:$0xff]  }
  0x26   :  { %2403 = vmatprep.subr.bf16.mxu0 %v3377_v0  ;;  %v3381_v2 = vld [vmem:[#allocation2] ss:$16 sps:$4 sm:$0xff]   ;;  %v3382_v3 = vld [vmem:[#allocation2 + $0x8] ss:$16 sps:$4 sm:$0xff]   ;;  %2661 = vmatprep.subr.bf16.mxu1 %v3379_v1  ;;  %v3383_v4 = vld [vmem:[#allocation2 + $0x24] ss:$16 sps:$4 sm:$0xff]  }
  0x27   :  { %2404 = vmatpush1.bf16.msra.mxu0 %v3381_v2  ;;  %2662 = vmatpush1.bf16.msra.mxu1 %v3382_v3  ;;  %v3385_v5 = vld [vmem:[#allocation2 + $0x2c] ss:$16 sps:$4 sm:$0xff]   ;;  %v3387_v6 = vld [vmem:[#allocation2 + $0x20] ss:$16 sps:$4 sm:$0xff]   ;;  %v3388_v7 = vld [vmem:[#allocation2 + $0x28] ss:$16 sps:$4 sm:$0xff]  }
  0x28   :  { %2405 = vmatprep.subr.bf16.mxu0 %v3383_v4  ;;  %2663 = vmatprep.subr.bf16.mxu1 %v3385_v5  ;;  %v3389_v8 = vld [vmem:[#allocation2 + $0x44] ss:$16 sps:$4 sm:$0xff]   ;;  %v3391_v9 = vld [vmem:[#allocation2 + $0x4c] ss:$16 sps:$4 sm:$0xff]   ;;  %v3393_v10 = vld [vmem:[#allocation2 + $0x40] ss:$16 sps:$4 sm:$0xff]  }
  0x29   :  { %v3394_v11 = vld [vmem:[#allocation2 + $0x48] ss:$16 sps:$4 sm:$0xff]   ;;  %v3395_v12 = vld [vmem:[#allocation2 + $0x64] ss:$16 sps:$4 sm:$0xff]   ;;  %v3397_v13 = vld [vmem:[#allocation2 + $0x6c] ss:$16 sps:$4 sm:$0xff]  }
  0x2a   :  { %v3399_v14 = vld [vmem:[#allocation2 + $0x60] ss:$16 sps:$4 sm:$0xff]   ;;  %v3400_v15 = vld [vmem:[#allocation2 + $0x68] ss:$16 sps:$4 sm:$0xff]   ;;  %v3401_v16 = vld [vmem:[#allocation2 + $0x84] ss:$16 sps:$4 sm:$0xff]  }
  0x2b   :  { %2406 = vmatpush1.bf16.msra.mxu0 %v3387_v6  ;;  %2664 = vmatpush1.bf16.msra.mxu1 %v3388_v7  ;;  %v3403_v17 = vld [vmem:[#allocation2 + $0x8c] ss:$16 sps:$4 sm:$0xff]   ;;  %v3405_v18 = vld [vmem:[#allocation2 + $0x80] ss:$16 sps:$4 sm:$0xff]   ;;  %v3406_v19 = vld [vmem:[#allocation2 + $0x88] ss:$16 sps:$4 sm:$0xff]  }
  0x2c   :  { %2407 = vmatprep.subr.bf16.mxu0 %v3389_v8  ;;  %2665 = vmatprep.subr.bf16.mxu1 %v3391_v9  ;;  %v3407_v20 = vld [vmem:[#allocation2 + $0xa4] ss:$16 sps:$4 sm:$0xff]   ;;  %v3409_v21 = vld [vmem:[#allocation2 + $0xac] ss:$16 sps:$4 sm:$0xff]   ;;  %v3411_v22 = vld [vmem:[#allocation2 + $0xa0] ss:$16 sps:$4 sm:$0xff]  }
  0x2d   :  { %v3412_v23 = vld [vmem:[#allocation2 + $0xa8] ss:$16 sps:$4 sm:$0xff]   ;;  %v3413_v24 = vld [vmem:[#allocation2 + $0xc4] ss:$16 sps:$4 sm:$0xff]   ;;  %v3415_v25 = vld [vmem:[#allocation2 + $0xcc] ss:$16 sps:$4 sm:$0xff]  }
  0x2e   :  { %v3417_v26 = vld [vmem:[#allocation2 + $0xc0] ss:$16 sps:$4 sm:$0xff]   ;;  %v3418_v27 = vld [vmem:[#allocation2 + $0xc8] ss:$16 sps:$4 sm:$0xff]   ;;  %v3419_v28 = vld [vmem:[#allocation2 + $0xe4] ss:$16 sps:$4 sm:$0xff]  }
  0x2f   :  { %2408 = vmatpush1.bf16.msra.mxu0 %v3393_v10  ;;  %2666 = vmatpush1.bf16.msra.mxu1 %v3394_v11  ;;  %v3421_v29 = vld [vmem:[#allocation2 + $0xec] ss:$16 sps:$4 sm:$0xff]   ;;  %v3423_v30 = vld [vmem:[#allocation2 + $0xe0] ss:$16 sps:$4 sm:$0xff]   ;;  %v3424_v31 = vld [vmem:[#allocation2 + $0xe8] ss:$16 sps:$4 sm:$0xff]  }
  0x30   :  { %2409 = vmatprep.subr.bf16.mxu0 %v3395_v12  ;;  %2667 = vmatprep.subr.bf16.mxu1 %v3397_v13  ;;  %v3425_v32 = vld [vmem:[#allocation2 + $0x104] ss:$16 sps:$4 sm:$0xff]   ;;  %v3427_v33 = vld [vmem:[#allocation2 + $0x10c] ss:$16 sps:$4 sm:$0xff]   ;;  %v3429_v34 = vld [vmem:[#allocation2 + $0x100] ss:$16 sps:$4 sm:$0xff]  }
  0x31   :  { %v3430_v35 = vld [vmem:[#allocation2 + $0x108] ss:$16 sps:$4 sm:$0xff]   ;;  %v3431_v36 = vld [vmem:[#allocation2 + $0x124] ss:$16 sps:$4 sm:$0xff]   ;;  %v3433_v37 = vld [vmem:[#allocation2 + $0x12c] ss:$16 sps:$4 sm:$0xff]  }
  0x32   :  { %v3435_v38 = vld [vmem:[#allocation2 + $0x120] ss:$16 sps:$4 sm:$0xff]   ;;  %v3436_v39 = vld [vmem:[#allocation2 + $0x128] ss:$16 sps:$4 sm:$0xff]   ;;  %v3437_v40 = vld [vmem:[#allocation2 + $0x144] ss:$16 sps:$4 sm:$0xff]  }
  0x33   :  { %2410 = vmatpush1.bf16.msra.mxu0 %v3399_v14  ;;  %2668 = vmatpush1.bf16.msra.mxu1 %v3400_v15  ;;  %v3439_v41 = vld [vmem:[#allocation2 + $0x14c] ss:$16 sps:$4 sm:$0xff]   ;;  %v3441_v42 = vld [vmem:[#allocation2 + $0x140] ss:$16 sps:$4 sm:$0xff]   ;;  %v3442_v43 = vld [vmem:[#allocation2 + $0x148] ss:$16 sps:$4 sm:$0xff]  }
  0x34   :  { %2411 = vmatprep.subr.bf16.mxu0 %v3401_v16  ;;  %2669 = vmatprep.subr.bf16.mxu1 %v3403_v17  ;;  %v3443_v44 = vld [vmem:[#allocation2 + $0x164] ss:$16 sps:$4 sm:$0xff]   ;;  %v3445_v45 = vld [vmem:[#allocation2 + $0x16c] ss:$16 sps:$4 sm:$0xff]   ;;  %v3447_v46 = vld [vmem:[#allocation2 + $0x160] ss:$16 sps:$4 sm:$0xff]  }
  0x35   :  { %v3448_v47 = vld [vmem:[#allocation2 + $0x168] ss:$16 sps:$4 sm:$0xff]   ;;  %v3475_v48 = vld [vmem:[%s4115_s0 + $0x4] ss:$48 sps:$4 sm:$0xff]   ;;  %v3451_v50 = vld [vmem:[#allocation2 + $0x18c] ss:$16 sps:$4 sm:$0xff]  }
  0x36   :  { %v3449_v49 = vld [vmem:[#allocation2 + $0x184] ss:$16 sps:$4 sm:$0xff]   ;;  %2435 = vmatprep.mubr.bf16.mxu0 %v3475_v48  ;;  %2693 = vmatprep.mubr.bf16.mxu1 %v3475_v48  ;;  %v3453_v51 = vld [vmem:[#allocation2 + $0x180] ss:$16 sps:$4 sm:$0xff]   ;;  %v3454_v52 = vld [vmem:[#allocation2 + $0x188] ss:$16 sps:$4 sm:$0xff]  }
  0x37   :  { %2412 = vmatpush1.bf16.msra.mxu0 %v3405_v18  ;;  %2670 = vmatpush1.bf16.msra.mxu1 %v3406_v19  ;;  %v3455_v53 = vld [vmem:[#allocation2 + $0x1a4] ss:$16 sps:$4 sm:$0xff]   ;;  %v3457_v54 = vld [vmem:[#allocation2 + $0x1ac] ss:$16 sps:$4 sm:$0xff]   ;;  %v3459_v55 = vld [vmem:[#allocation2 + $0x1a0] ss:$16 sps:$4 sm:$0xff]  }
  0x38   :  { %2413 = vmatprep.subr.bf16.mxu0 %v3407_v20  ;;  %2671 = vmatprep.subr.bf16.mxu1 %v3409_v21  ;;  %v3460_v56 = vld [vmem:[#allocation2 + $0x1a8] ss:$16 sps:$4 sm:$0xff]   ;;  %v3461_v57 = vld [vmem:[#allocation2 + $0x1c4] ss:$16 sps:$4 sm:$0xff]   ;;  %v3463_v58 = vld [vmem:[#allocation2 + $0x1cc] ss:$16 sps:$4 sm:$0xff]  }
  0x39   :  { %v3465_v59 = vld [vmem:[#allocation2 + $0x1c0] ss:$16 sps:$4 sm:$0xff]   ;;  %v3466_v60 = vld [vmem:[#allocation2 + $0x1c8] ss:$16 sps:$4 sm:$0xff]   ;;  %v3467_v61 = vld [vmem:[#allocation2 + $0x1e4] ss:$16 sps:$4 sm:$0xff]  }
  0x3a   :  { %v3469_v62 = vld [vmem:[#allocation2 + $0x1ec] ss:$16 sps:$4 sm:$0xff]   ;;  %v3471_v63 = vld [vmem:[#allocation2 + $0x1e0] ss:$16 sps:$4 sm:$0xff]   ;;  %v3472_v0 = vld [vmem:[#allocation2 + $0x1e8] ss:$16 sps:$4 sm:$0xff]  }
  0x3b   :  { %2414 = vmatpush1.bf16.msra.mxu0 %v3411_v22  ;;  %2672 = vmatpush1.bf16.msra.mxu1 %v3412_v23  ;;  %v3478_v1 = vld [vmem:[#allocation2 + $0x204] ss:$16 sps:$4 sm:$0xff]   ;;  %v3481_v2 = vld [vmem:[#allocation2 + $0x20c] ss:$16 sps:$4 sm:$0xff]   ;;  %v3473_v3 = vld [vmem:[%s4115_s0] ss:$48 sps:$4 sm:$0xff]  }
  0x3c   :  { %2415 = vmatprep.subr.bf16.mxu0 %v3413_v24  ;;  %2673 = vmatprep.subr.bf16.mxu1 %v3415_v25  ;;  %v3476_v4 = vld [vmem:[#allocation2 + $0x200] ss:$16 sps:$4 sm:$0xff]   ;;  %v3479_v5 = vld [vmem:[#allocation2 + $0x208] ss:$16 sps:$4 sm:$0xff]   ;;  %v3484_v6 = vld [vmem:[#allocation2 + $0x224] ss:$16 sps:$4 sm:$0xff]  }
  0x3d   :  { %v3487_v7 = vld [vmem:[#allocation2 + $0x22c] ss:$16 sps:$4 sm:$0xff]   ;;  %v3482_v8 = vld [vmem:[#allocation2 + $0x220] ss:$16 sps:$4 sm:$0xff]   ;;  %v3485_v9 = vld [vmem:[#allocation2 + $0x228] ss:$16 sps:$4 sm:$0xff]  }
  0x3e   :  { %v3490_v10 = vld [vmem:[#allocation2 + $0x244] ss:$16 sps:$4 sm:$0xff]   ;;  %v3493_v11 = vld [vmem:[#allocation2 + $0x24c] ss:$16 sps:$4 sm:$0xff]   ;;  %v3488_v12 = vld [vmem:[#allocation2 + $0x240] ss:$16 sps:$4 sm:$0xff]  }
  0x3f   :  { %2416 = vmatpush1.bf16.msra.mxu0 %v3417_v26  ;;  %2674 = vmatpush1.bf16.msra.mxu1 %v3418_v27  ;;  %v3491_v13 = vld [vmem:[#allocation2 + $0x248] ss:$16 sps:$4 sm:$0xff]   ;;  %v3496_v14 = vld [vmem:[#allocation2 + $0x264] ss:$16 sps:$4 sm:$0xff]   ;;  %v3499_v15 = vld [vmem:[#allocation2 + $0x26c] ss:$16 sps:$4 sm:$0xff]  }
  0x40   :  { %2417 = vmatprep.subr.bf16.mxu0 %v3419_v28  ;;  %2675 = vmatprep.subr.bf16.mxu1 %v3421_v29  ;;  %v3494_v16 = vld [vmem:[#allocation2 + $0x260] ss:$16 sps:$4 sm:$0xff]   ;;  %v3497_v17 = vld [vmem:[#allocation2 + $0x268] ss:$16 sps:$4 sm:$0xff]   ;;  %v3502_v18 = vld [vmem:[#allocation2 + $0x284] ss:$16 sps:$4 sm:$0xff]  }
  0x41   :  { %v3505_v19 = vld [vmem:[#allocation2 + $0x28c] ss:$16 sps:$4 sm:$0xff]   ;;  %v3500_v20 = vld [vmem:[#allocation2 + $0x280] ss:$16 sps:$4 sm:$0xff]   ;;  %v3503_v21 = vld [vmem:[#allocation2 + $0x288] ss:$16 sps:$4 sm:$0xff]  }
  0x42   :  { %v3508_v22 = vld [vmem:[#allocation2 + $0x2a4] ss:$16 sps:$4 sm:$0xff]   ;;  %v3511_v23 = vld [vmem:[#allocation2 + $0x2ac] ss:$16 sps:$4 sm:$0xff]   ;;  %v3506_v24 = vld [vmem:[#allocation2 + $0x2a0] ss:$16 sps:$4 sm:$0xff]  }
  0x43   :  { %2418 = vmatpush1.bf16.msra.mxu0 %v3423_v30  ;;  %2676 = vmatpush1.bf16.msra.mxu1 %v3424_v31  ;;  %v3509_v25 = vld [vmem:[#allocation2 + $0x2a8] ss:$16 sps:$4 sm:$0xff]   ;;  %v3514_v26 = vld [vmem:[#allocation2 + $0x2c4] ss:$16 sps:$4 sm:$0xff]   ;;  %v3517_v27 = vld [vmem:[#allocation2 + $0x2cc] ss:$16 sps:$4 sm:$0xff]  }
  0x44   :  { %2419 = vmatprep.subr.bf16.mxu0 %v3425_v32  ;;  %2677 = vmatprep.subr.bf16.mxu1 %v3427_v33  ;;  %v3512_v28 = vld [vmem:[#allocation2 + $0x2c0] ss:$16 sps:$4 sm:$0xff]   ;;  %v3515_v29 = vld [vmem:[#allocation2 + $0x2c8] ss:$16 sps:$4 sm:$0xff]   ;;  %v3574_v30 = vld [vmem:[%s4115_s0 + $0xc] ss:$48 sps:$4 sm:$0xff]  }
  0x45   :  { %v3520_v31 = vld [vmem:[#allocation2 + $0x2e4] ss:$16 sps:$4 sm:$0xff]   ;;  %v3523_v32 = vld [vmem:[#allocation2 + $0x2ec] ss:$16 sps:$4 sm:$0xff]   ;;  %v3518_v33 = vld [vmem:[#allocation2 + $0x2e0] ss:$16 sps:$4 sm:$0xff]  }
  0x46   :  { %v3547_v48 = vld [vmem:[#allocation2 + $0x36c] ss:$16 sps:$4 sm:$0xff]   ;;  %vm2386_vm0 = vcmask 752640   ;;  %vm2390_vm1 = vcmask 1045504  }
  0x47   :  { %2420 = vmatpush1.bf16.msra.mxu0 %v3429_v34  ;;  %2678 = vmatpush1.bf16.msra.mxu1 %v3430_v35  ;;  %v3521_v34 = vld [vmem:[#allocation2 + $0x2e8] ss:$16 sps:$4 sm:$0xff]   ;;  %v3526_v35 = vld [vmem:[#allocation2 + $0x304] ss:$16 sps:$4 sm:$0xff]  }
  0x48   :  { %2421 = vmatprep.subr.bf16.mxu0 %v3431_v36  ;;  %2679 = vmatprep.subr.bf16.mxu1 %v3433_v37  ;;  %v3529_v36 = vld [vmem:[#allocation2 + $0x30c] ss:$16 sps:$4 sm:$0xff]   ;;  %v3524_v37 = vld [vmem:[#allocation2 + $0x300] ss:$16 sps:$4 sm:$0xff]  }
  0x4b   :  { %2422 = vmatpush1.bf16.msra.mxu0 %v3435_v38  ;;  %2680 = vmatpush1.bf16.msra.mxu1 %v3436_v39  ;;  %v3527_v38 = vld [vmem:[#allocation2 + $0x308] ss:$16 sps:$4 sm:$0xff]   ;;  %v3532_v39 = vld [vmem:[#allocation2 + $0x324] ss:$16 sps:$4 sm:$0xff]  }
  0x4c   :  { %2423 = vmatprep.subr.bf16.mxu0 %v3437_v40  ;;  %2681 = vmatprep.subr.bf16.mxu1 %v3439_v41  ;;  %v3535_v40 = vld [vmem:[#allocation2 + $0x32c] ss:$16 sps:$4 sm:$0xff]   ;;  %v3530_v41 = vld [vmem:[#allocation2 + $0x320] ss:$16 sps:$4 sm:$0xff]  }
  0x4f   :  { %2424 = vmatpush1.bf16.msra.mxu0 %v3441_v42  ;;  %2682 = vmatpush1.bf16.msra.mxu1 %v3442_v43  ;;  %v3533_v42 = vld [vmem:[#allocation2 + $0x328] ss:$16 sps:$4 sm:$0xff]   ;;  %v3538_v43 = vld [vmem:[#allocation2 + $0x344] ss:$16 sps:$4 sm:$0xff]  }
  0x50   :  { %2425 = vmatprep.subr.bf16.mxu0 %v3443_v44  ;;  %2683 = vmatprep.subr.bf16.mxu1 %v3445_v45  ;;  %v3541_v44 = vld [vmem:[#allocation2 + $0x34c] ss:$16 sps:$4 sm:$0xff]   ;;  %v3536_v45 = vld [vmem:[#allocation2 + $0x340] ss:$16 sps:$4 sm:$0xff]  }
  0x53   :  { %2426 = vmatpush1.bf16.msra.mxu0 %v3447_v46  ;;  %2684 = vmatpush1.bf16.msra.mxu1 %v3448_v47  ;;  %v3539_v46 = vld [vmem:[#allocation2 + $0x348] ss:$16 sps:$4 sm:$0xff]   ;;  %v3544_v47 = vld [vmem:[#allocation2 + $0x364] ss:$16 sps:$4 sm:$0xff]  }
  0x54   :  { %2427 = vmatprep.subr.bf16.mxu0 %v3449_v49  ;;  %2685 = vmatprep.subr.bf16.mxu1 %v3451_v50  ;;  %v3542_v49 = vld [vmem:[#allocation2 + $0x360] ss:$16 sps:$4 sm:$0xff]   ;;  %v3545_v50 = vld [vmem:[#allocation2 + $0x368] ss:$16 sps:$4 sm:$0xff]  }
  0x57   :  { %2428 = vmatpush1.bf16.msra.mxu0 %v3453_v51  ;;  %2686 = vmatpush1.bf16.msra.mxu1 %v3454_v52  ;;  %v3550_v51 = vld [vmem:[#allocation2 + $0x384] ss:$16 sps:$4 sm:$0xff]   ;;  %v3553_v52 = vld [vmem:[#allocation2 + $0x38c] ss:$16 sps:$4 sm:$0xff]  }
  0x58   :  { %2429 = vmatprep.subr.bf16.mxu0 %v3455_v53  ;;  %2687 = vmatprep.subr.bf16.mxu1 %v3457_v54  ;;  %v3548_v53 = vld [vmem:[#allocation2 + $0x380] ss:$16 sps:$4 sm:$0xff]   ;;  %v3551_v54 = vld [vmem:[#allocation2 + $0x388] ss:$16 sps:$4 sm:$0xff]  }
  0x5b   :  { %2430 = vmatpush1.bf16.msra.mxu0 %v3459_v55  ;;  %2688 = vmatpush1.bf16.msra.mxu1 %v3460_v56  ;;  %v3556_v55 = vld [vmem:[#allocation2 + $0x3a4] ss:$16 sps:$4 sm:$0xff]   ;;  %v3559_v56 = vld [vmem:[#allocation2 + $0x3ac] ss:$16 sps:$4 sm:$0xff]  }
  0x5c   :  { %2431 = vmatprep.subr.bf16.mxu0 %v3461_v57  ;;  %2689 = vmatprep.subr.bf16.mxu1 %v3463_v58  ;;  %v3554_v57 = vld [vmem:[#allocation2 + $0x3a0] ss:$16 sps:$4 sm:$0xff]   ;;  %v3557_v58 = vld [vmem:[#allocation2 + $0x3a8] ss:$16 sps:$4 sm:$0xff]  }
  0x5f   :  { %2432 = vmatpush1.bf16.msra.mxu0 %v3465_v59  ;;  %2690 = vmatpush1.bf16.msra.mxu1 %v3466_v60  ;;  %v3562_v59 = vld [vmem:[#allocation2 + $0x3c4] ss:$16 sps:$4 sm:$0xff]   ;;  %v3565_v60 = vld [vmem:[#allocation2 + $0x3cc] ss:$16 sps:$4 sm:$0xff]  }
  0x60   :  { %2433 = vmatprep.subr.bf16.mxu0 %v3467_v61  ;;  %2691 = vmatprep.subr.bf16.mxu1 %v3469_v62  ;;  %v3560_v61 = vld [vmem:[#allocation2 + $0x3c0] ss:$16 sps:$4 sm:$0xff]   ;;  %v3563_v62 = vld [vmem:[#allocation2 + $0x3c8] ss:$16 sps:$4 sm:$0xff]  }
  0x63   :  { %2434 = vmatpush1.bf16.msra.mxu0 %v3471_v63  ;;  %2692 = vmatpush1.bf16.msra.mxu1 %v3472_v0  ;;  %v3568_v63 = vld [vmem:[#allocation2 + $0x3e4] ss:$16 sps:$4 sm:$0xff]   ;;  %v3571_v0 = vld [vmem:[#allocation2 + $0x3ec] ss:$16 sps:$4 sm:$0xff]  }
  0x64   :  { %2446 = vmatprep.subr.bf16.mxu0 %v3478_v1  ;;  %2704 = vmatprep.subr.bf16.mxu1 %v3481_v2  ;;  %v3566_v1 = vld [vmem:[#allocation2 + $0x3e0] ss:$16 sps:$4 sm:$0xff]   ;;  %v3569_v2 = vld [vmem:[#allocation2 + $0x3e8] ss:$16 sps:$4 sm:$0xff]  }
  0x66   :  { %2436 = vmatmul.mubr.bf16.vlgmr.msra.gmra.mrb[0].mxu0 %v3473_v3  ;;  %2694 = vmatmul.mubr.bf16.vlgmr.msra.gmra.mrb[0].mxu1 %v3473_v3  ;;  %v3577_v3 = vld [vmem:[#allocation2 + $0x404] ss:$16 sps:$4 sm:$0xff]  }
  0x67   :  { %2447 = vmatpush1.bf16.msra.mxu0 %v3476_v4  ;;  %2705 = vmatpush1.bf16.msra.mxu1 %v3479_v5  ;;  %v3580_v4 = vld [vmem:[#allocation2 + $0x40c] ss:$16 sps:$4 sm:$0xff]   ;;  %v3572_v5 = vld [vmem:[%s4115_s0 + $0x8] ss:$48 sps:$4 sm:$0xff]  }
  0x68   :  { %2448 = vmatprep.subr.bf16.mxu0 %v3484_v6  ;;  %2706 = vmatprep.subr.bf16.mxu1 %v3487_v7  ;;  %v3575_v6 = vld [vmem:[#allocation2 + $0x400] ss:$16 sps:$4 sm:$0xff]   ;;  %v3578_v7 = vld [vmem:[#allocation2 + $0x408] ss:$16 sps:$4 sm:$0xff]  }
  0x69   :  { %2478 = vmatprep.mubr.bf16.mxu0 %v3574_v30  ;;  %2736 = vmatprep.mubr.bf16.mxu1 %v3574_v30  ;;  %v3616_v30 = vld [vmem:[#allocation2 + $0x4cc] ss:$16 sps:$4 sm:$0xff]  }
  0x6b   :  { %2449 = vmatpush1.bf16.msra.mxu0 %v3482_v8  ;;  %2707 = vmatpush1.bf16.msra.mxu1 %v3485_v9  ;;  %v3583_v8 = vld [vmem:[#allocation2 + $0x424] ss:$16 sps:$4 sm:$0xff]   ;;  %v3586_v9 = vld [vmem:[#allocation2 + $0x42c] ss:$16 sps:$4 sm:$0xff]  }
  0x6c   :  { %2450 = vmatprep.subr.bf16.mxu0 %v3490_v10  ;;  %2708 = vmatprep.subr.bf16.mxu1 %v3493_v11  ;;  %v3581_v10 = vld [vmem:[#allocation2 + $0x420] ss:$16 sps:$4 sm:$0xff]   ;;  %v3584_v11 = vld [vmem:[#allocation2 + $0x428] ss:$16 sps:$4 sm:$0xff]  }
  0x6f   :  { %2451 = vmatpush1.bf16.msra.mxu0 %v3488_v12  ;;  %2709 = vmatpush1.bf16.msra.mxu1 %v3491_v13  ;;  %v3673_v12 = vld [vmem:[%s4115_s0 + $0x14] ss:$48 sps:$4 sm:$0xff]  }
  0x70   :  { %2452 = vmatprep.subr.bf16.mxu0 %v3496_v14  ;;  %2710 = vmatprep.subr.bf16.mxu1 %v3499_v15  ;;  %v3589_v13 = vld [vmem:[#allocation2 + $0x444] ss:$16 sps:$4 sm:$0xff]   ;;  %v3592_v14 = vld [vmem:[#allocation2 + $0x44c] ss:$16 sps:$4 sm:$0xff]   ;;  %v3587_v15 = vld [vmem:[#allocation2 + $0x440] ss:$16 sps:$4 sm:$0xff]  }
  0x73   :  { %2453 = vmatpush1.bf16.msra.mxu0 %v3494_v16  ;;  %2711 = vmatpush1.bf16.msra.mxu1 %v3497_v17  ;;  %v3590_v16 = vld [vmem:[#allocation2 + $0x448] ss:$16 sps:$4 sm:$0xff]   ;;  %v3595_v17 = vld [vmem:[#allocation2 + $0x464] ss:$16 sps:$4 sm:$0xff]  }
  0x74   :  { %2454 = vmatprep.subr.bf16.mxu0 %v3502_v18  ;;  %2712 = vmatprep.subr.bf16.mxu1 %v3505_v19  ;;  %v3598_v18 = vld [vmem:[#allocation2 + $0x46c] ss:$16 sps:$4 sm:$0xff]   ;;  %v3593_v19 = vld [vmem:[#allocation2 + $0x460] ss:$16 sps:$4 sm:$0xff]  }
  0x77   :  { %2455 = vmatpush1.bf16.msra.mxu0 %v3500_v20  ;;  %2713 = vmatpush1.bf16.msra.mxu1 %v3503_v21  ;;  %v3596_v20 = vld [vmem:[#allocation2 + $0x468] ss:$16 sps:$4 sm:$0xff]   ;;  %v3601_v21 = vld [vmem:[#allocation2 + $0x484] ss:$16 sps:$4 sm:$0xff]  }
  0x78   :  { %2456 = vmatprep.subr.bf16.mxu0 %v3508_v22  ;;  %2714 = vmatprep.subr.bf16.mxu1 %v3511_v23  ;;  %v3604_v22 = vld [vmem:[#allocation2 + $0x48c] ss:$16 sps:$4 sm:$0xff]   ;;  %v3599_v23 = vld [vmem:[#allocation2 + $0x480] ss:$16 sps:$4 sm:$0xff]  }
  0x7b   :  { %2457 = vmatpush1.bf16.msra.mxu0 %v3506_v24  ;;  %2715 = vmatpush1.bf16.msra.mxu1 %v3509_v25  ;;  %v3602_v24 = vld [vmem:[#allocation2 + $0x488] ss:$16 sps:$4 sm:$0xff]   ;;  %v3607_v25 = vld [vmem:[#allocation2 + $0x4a4] ss:$16 sps:$4 sm:$0xff]  }
  0x7c   :  { %2458 = vmatprep.subr.bf16.mxu0 %v3514_v26  ;;  %2716 = vmatprep.subr.bf16.mxu1 %v3517_v27  ;;  %v3610_v26 = vld [vmem:[#allocation2 + $0x4ac] ss:$16 sps:$4 sm:$0xff]   ;;  %v3605_v27 = vld [vmem:[#allocation2 + $0x4a0] ss:$16 sps:$4 sm:$0xff]  }
  0x7f   :  { %2459 = vmatpush1.bf16.msra.mxu0 %v3512_v28  ;;  %2717 = vmatpush1.bf16.msra.mxu1 %v3515_v29  ;;  %v3608_v28 = vld [vmem:[#allocation2 + $0x4a8] ss:$16 sps:$4 sm:$0xff]   ;;  %v3613_v29 = vld [vmem:[#allocation2 + $0x4c4] ss:$16 sps:$4 sm:$0xff]  }
  0x80   :  { %2460 = vmatprep.subr.bf16.mxu0 %v3520_v31  ;;  %2718 = vmatprep.subr.bf16.mxu1 %v3523_v32  ;;  %v3611_v31 = vld [vmem:[#allocation2 + $0x4c0] ss:$16 sps:$4 sm:$0xff]   ;;  %v3614_v32 = vld [vmem:[#allocation2 + $0x4c8] ss:$16 sps:$4 sm:$0xff]  }
  0x83   :  { %2461 = vmatpush1.bf16.msra.mxu0 %v3518_v33  ;;  %2719 = vmatpush1.bf16.msra.mxu1 %v3521_v34  ;;  %v3619_v33 = vld [vmem:[#allocation2 + $0x4e4] ss:$16 sps:$4 sm:$0xff]   ;;  %v3622_v34 = vld [vmem:[#allocation2 + $0x4ec] ss:$16 sps:$4 sm:$0xff]  }
  0x84   :  { %2462 = vmatprep.subr.bf16.mxu0 %v3526_v35  ;;  %2720 = vmatprep.subr.bf16.mxu1 %v3529_v36  ;;  %v3617_v35 = vld [vmem:[#allocation2 + $0x4e0] ss:$16 sps:$4 sm:$0xff]   ;;  %v3620_v36 = vld [vmem:[#allocation2 + $0x4e8] ss:$16 sps:$4 sm:$0xff]  }
  0x87   :  { %2463 = vmatpush1.bf16.msra.mxu0 %v3524_v37  ;;  %2721 = vmatpush1.bf16.msra.mxu1 %v3527_v38  ;;  %v3625_v37 = vld [vmem:[#allocation2 + $0x504] ss:$16 sps:$4 sm:$0xff]   ;;  %v3628_v38 = vld [vmem:[#allocation2 + $0x50c] ss:$16 sps:$4 sm:$0xff]  }
  0x88   :  { %2464 = vmatprep.subr.bf16.mxu0 %v3532_v39  ;;  %2722 = vmatprep.subr.bf16.mxu1 %v3535_v40  ;;  %v3623_v39 = vld [vmem:[#allocation2 + $0x500] ss:$16 sps:$4 sm:$0xff]   ;;  %v3626_v40 = vld [vmem:[#allocation2 + $0x508] ss:$16 sps:$4 sm:$0xff]  }
  0x8b   :  { %2465 = vmatpush1.bf16.msra.mxu0 %v3530_v41  ;;  %2723 = vmatpush1.bf16.msra.mxu1 %v3533_v42  ;;  %v3631_v41 = vld [vmem:[#allocation2 + $0x524] ss:$16 sps:$4 sm:$0xff]   ;;  %v3634_v42 = vld [vmem:[#allocation2 + $0x52c] ss:$16 sps:$4 sm:$0xff]  }
  0x8c   :  { %2466 = vmatprep.subr.bf16.mxu0 %v3538_v43  ;;  %2724 = vmatprep.subr.bf16.mxu1 %v3541_v44  ;;  %v3629_v43 = vld [vmem:[#allocation2 + $0x520] ss:$16 sps:$4 sm:$0xff]   ;;  %v3632_v44 = vld [vmem:[#allocation2 + $0x528] ss:$16 sps:$4 sm:$0xff]  }
  0x8f   :  { %2467 = vmatpush1.bf16.msra.mxu0 %v3536_v45  ;;  %2725 = vmatpush1.bf16.msra.mxu1 %v3539_v46  ;;  %v3637_v45 = vld [vmem:[#allocation2 + $0x544] ss:$16 sps:$4 sm:$0xff]   ;;  %v3640_v46 = vld [vmem:[#allocation2 + $0x54c] ss:$16 sps:$4 sm:$0xff]  }
  0x90   :  { %2468 = vmatprep.subr.bf16.mxu0 %v3544_v47  ;;  %2726 = vmatprep.subr.bf16.mxu1 %v3547_v48  ;;  %v3635_v47 = vld [vmem:[#allocation2 + $0x540] ss:$16 sps:$4 sm:$0xff]   ;;  %v3638_v48 = vld [vmem:[#allocation2 + $0x548] ss:$16 sps:$4 sm:$0xff]  }
  0x93   :  { %2469 = vmatpush1.bf16.msra.mxu0 %v3542_v49  ;;  %2727 = vmatpush1.bf16.msra.mxu1 %v3545_v50  ;;  %v3643_v49 = vld [vmem:[#allocation2 + $0x564] ss:$16 sps:$4 sm:$0xff]   ;;  %v3646_v50 = vld [vmem:[#allocation2 + $0x56c] ss:$16 sps:$4 sm:$0xff]  }
  0x94   :  { %2470 = vmatprep.subr.bf16.mxu0 %v3550_v51  ;;  %2728 = vmatprep.subr.bf16.mxu1 %v3553_v52  ;;  %v3641_v51 = vld [vmem:[#allocation2 + $0x560] ss:$16 sps:$4 sm:$0xff]   ;;  %v3644_v52 = vld [vmem:[#allocation2 + $0x568] ss:$16 sps:$4 sm:$0xff]  }
  0x97   :  { %2471 = vmatpush1.bf16.msra.mxu0 %v3548_v53  ;;  %2729 = vmatpush1.bf16.msra.mxu1 %v3551_v54  ;;  %v3649_v53 = vld [vmem:[#allocation2 + $0x584] ss:$16 sps:$4 sm:$0xff]   ;;  %v3652_v54 = vld [vmem:[#allocation2 + $0x58c] ss:$16 sps:$4 sm:$0xff]  }
  0x98   :  { %2472 = vmatprep.subr.bf16.mxu0 %v3556_v55  ;;  %2730 = vmatprep.subr.bf16.mxu1 %v3559_v56  ;;  %v3647_v55 = vld [vmem:[#allocation2 + $0x580] ss:$16 sps:$4 sm:$0xff]   ;;  %v3650_v56 = vld [vmem:[#allocation2 + $0x588] ss:$16 sps:$4 sm:$0xff]  }
  0x9b   :  { %2473 = vmatpush1.bf16.msra.mxu0 %v3554_v57  ;;  %2731 = vmatpush1.bf16.msra.mxu1 %v3557_v58  ;;  %v3655_v57 = vld [vmem:[#allocation2 + $0x5a4] ss:$16 sps:$4 sm:$0xff]   ;;  %v3658_v58 = vld [vmem:[#allocation2 + $0x5ac] ss:$16 sps:$4 sm:$0xff]  }
  0x9c   :  { %2474 = vmatprep.subr.bf16.mxu0 %v3562_v59  ;;  %2732 = vmatprep.subr.bf16.mxu1 %v3565_v60  ;;  %v3653_v59 = vld [vmem:[#allocation2 + $0x5a0] ss:$16 sps:$4 sm:$0xff]   ;;  %v3656_v60 = vld [vmem:[#allocation2 + $0x5a8] ss:$16 sps:$4 sm:$0xff]  }
  0x9f   :  { %2475 = vmatpush1.bf16.msra.mxu0 %v3560_v61  ;;  %2733 = vmatpush1.bf16.msra.mxu1 %v3563_v62  ;;  %v3661_v61 = vld [vmem:[#allocation2 + $0x5c4] ss:$16 sps:$4 sm:$0xff]   ;;  %v3664_v62 = vld [vmem:[#allocation2 + $0x5cc] ss:$16 sps:$4 sm:$0xff]  }
  0xa0   :  { %2476 = vmatprep.subr.bf16.mxu0 %v3568_v63  ;;  %2734 = vmatprep.subr.bf16.mxu1 %v3571_v0  ;;  %v3659_v63 = vld [vmem:[#allocation2 + $0x5c0] ss:$16 sps:$4 sm:$0xff]   ;;  %v3662_v0 = vld [vmem:[#allocation2 + $0x5c8] ss:$16 sps:$4 sm:$0xff]  }
  0xa3   :  { %2477 = vmatpush1.bf16.msra.mxu0 %v3566_v1  ;;  %2735 = vmatpush1.bf16.msra.mxu1 %v3569_v2  ;;  %v3667_v1 = vld [vmem:[#allocation2 + $0x5e4] ss:$16 sps:$4 sm:$0xff]   ;;  %v3670_v2 = vld [vmem:[#allocation2 + $0x5ec] ss:$16 sps:$4 sm:$0xff]  }
  0xa4   :  { %2489 = vmatprep.subr.bf16.mxu0 %v3577_v3  ;;  %2747 = vmatprep.subr.bf16.mxu1 %v3580_v4  ;;  %v3665_v3 = vld [vmem:[#allocation2 + $0x5e0] ss:$16 sps:$4 sm:$0xff]   ;;  %v3668_v4 = vld [vmem:[#allocation2 + $0x5e8] ss:$16 sps:$4 sm:$0xff]  }
  0xa6   :  { %2479 = vmatmul.mubr.bf16.vlgmr.msra.gmra.mrb[0].mxu0 %v3572_v5  ;;  %2737 = vmatmul.mubr.bf16.vlgmr.msra.gmra.mrb[0].mxu1 %v3572_v5  ;;  %v3676_v5 = vld [vmem:[#allocation2 + $0x604] ss:$16 sps:$4 sm:$0xff]  }
  0xa7   :  { %2490 = vmatpush1.bf16.msra.mxu0 %v3575_v6  ;;  %2748 = vmatpush1.bf16.msra.mxu1 %v3578_v7  ;;  %v3679_v6 = vld [vmem:[#allocation2 + $0x60c] ss:$16 sps:$4 sm:$0xff]   ;;  %v3671_v7 = vld [vmem:[%s4115_s0 + $0x10] ss:$48 sps:$4 sm:$0xff]  }
  0xa8   :  { %2491 = vmatprep.subr.bf16.mxu0 %v3583_v8  ;;  %2749 = vmatprep.subr.bf16.mxu1 %v3586_v9  ;;  %v3674_v8 = vld [vmem:[#allocation2 + $0x600] ss:$16 sps:$4 sm:$0xff]   ;;  %v3677_v9 = vld [vmem:[#allocation2 + $0x608] ss:$16 sps:$4 sm:$0xff]  }
  0xa9   :  { %2521 = vmatprep.mubr.bf16.mxu0 %v3673_v12  ;;  %2779 = vmatprep.mubr.bf16.mxu1 %v3673_v12  ;;  %v3772_v12 = vld [vmem:[%s4115_s0 + $0x1c] ss:$48 sps:$4 sm:$0xff]  }
  0xab   :  { %2492 = vmatpush1.bf16.msra.mxu0 %v3581_v10  ;;  %2750 = vmatpush1.bf16.msra.mxu1 %v3584_v11  ;;  %v3682_v10 = vld [vmem:[#allocation2 + $0x624] ss:$16 sps:$4 sm:$0xff]   ;;  %v3685_v11 = vld [vmem:[#allocation2 + $0x62c] ss:$16 sps:$4 sm:$0xff]  }
  0xac   :  { %2493 = vmatprep.subr.bf16.mxu0 %v3589_v13  ;;  %2751 = vmatprep.subr.bf16.mxu1 %v3592_v14  ;;  %v3680_v13 = vld [vmem:[#allocation2 + $0x620] ss:$16 sps:$4 sm:$0xff]   ;;  %v3683_v14 = vld [vmem:[#allocation2 + $0x628] ss:$16 sps:$4 sm:$0xff]  }
  0xaf   :  { %2494 = vmatpush1.bf16.msra.mxu0 %v3587_v15  ;;  %2752 = vmatpush1.bf16.msra.mxu1 %v3590_v16  ;;  %v3688_v15 = vld [vmem:[#allocation2 + $0x644] ss:$16 sps:$4 sm:$0xff]   ;;  %v3691_v16 = vld [vmem:[#allocation2 + $0x64c] ss:$16 sps:$4 sm:$0xff]  }
  0xb0   :  { %2495 = vmatprep.subr.bf16.mxu0 %v3595_v17  ;;  %2753 = vmatprep.subr.bf16.mxu1 %v3598_v18  ;;  %v3686_v17 = vld [vmem:[#allocation2 + $0x640] ss:$16 sps:$4 sm:$0xff]   ;;  %v3689_v18 = vld [vmem:[#allocation2 + $0x648] ss:$16 sps:$4 sm:$0xff]  }
  0xb3   :  { %2496 = vmatpush1.bf16.msra.mxu0 %v3593_v19  ;;  %2754 = vmatpush1.bf16.msra.mxu1 %v3596_v20  ;;  %v3694_v19 = vld [vmem:[#allocation2 + $0x664] ss:$16 sps:$4 sm:$0xff]   ;;  %v3697_v20 = vld [vmem:[#allocation2 + $0x66c] ss:$16 sps:$4 sm:$0xff]  }
  0xb4   :  { %2497 = vmatprep.subr.bf16.mxu0 %v3601_v21  ;;  %2755 = vmatprep.subr.bf16.mxu1 %v3604_v22  ;;  %v3692_v21 = vld [vmem:[#allocation2 + $0x660] ss:$16 sps:$4 sm:$0xff]   ;;  %v3695_v22 = vld [vmem:[#allocation2 + $0x668] ss:$16 sps:$4 sm:$0xff]  }
  0xb7   :  { %2498 = vmatpush1.bf16.msra.mxu0 %v3599_v23  ;;  %2756 = vmatpush1.bf16.msra.mxu1 %v3602_v24  ;;  %v3700_v23 = vld [vmem:[#allocation2 + $0x684] ss:$16 sps:$4 sm:$0xff]   ;;  %v3703_v24 = vld [vmem:[#allocation2 + $0x68c] ss:$16 sps:$4 sm:$0xff]  }
  0xb8   :  { %2499 = vmatprep.subr.bf16.mxu0 %v3607_v25  ;;  %2757 = vmatprep.subr.bf16.mxu1 %v3610_v26  ;;  %v3698_v25 = vld [vmem:[#allocation2 + $0x680] ss:$16 sps:$4 sm:$0xff]   ;;  %v3701_v26 = vld [vmem:[#allocation2 + $0x688] ss:$16 sps:$4 sm:$0xff]  }
  0xbb   :  { %2500 = vmatpush1.bf16.msra.mxu0 %v3605_v27  ;;  %2758 = vmatpush1.bf16.msra.mxu1 %v3608_v28  ;;  %v3706_v27 = vld [vmem:[#allocation2 + $0x6a4] ss:$16 sps:$4 sm:$0xff]   ;;  %v3709_v28 = vld [vmem:[#allocation2 + $0x6ac] ss:$16 sps:$4 sm:$0xff]  }
  0xbc   :  { %2501 = vmatprep.subr.bf16.mxu0 %v3613_v29  ;;  %2759 = vmatprep.subr.bf16.mxu1 %v3616_v30  ;;  %v3704_v29 = vld [vmem:[#allocation2 + $0x6a0] ss:$16 sps:$4 sm:$0xff]   ;;  %v3707_v30 = vld [vmem:[#allocation2 + $0x6a8] ss:$16 sps:$4 sm:$0xff]  }
  0xbf   :  { %2502 = vmatpush1.bf16.msra.mxu0 %v3611_v31  ;;  %2760 = vmatpush1.bf16.msra.mxu1 %v3614_v32  ;;  %v3712_v31 = vld [vmem:[#allocation2 + $0x6c4] ss:$16 sps:$4 sm:$0xff]   ;;  %v3715_v32 = vld [vmem:[#allocation2 + $0x6cc] ss:$16 sps:$4 sm:$0xff]  }
  0xc0   :  { %2503 = vmatprep.subr.bf16.mxu0 %v3619_v33  ;;  %2761 = vmatprep.subr.bf16.mxu1 %v3622_v34  ;;  %v3710_v33 = vld [vmem:[#allocation2 + $0x6c0] ss:$16 sps:$4 sm:$0xff]   ;;  %v3713_v34 = vld [vmem:[#allocation2 + $0x6c8] ss:$16 sps:$4 sm:$0xff]  }
  0xc3   :  { %2504 = vmatpush1.bf16.msra.mxu0 %v3617_v35  ;;  %2762 = vmatpush1.bf16.msra.mxu1 %v3620_v36  ;;  %v3718_v35 = vld [vmem:[#allocation2 + $0x6e4] ss:$16 sps:$4 sm:$0xff]   ;;  %v3721_v36 = vld [vmem:[#allocation2 + $0x6ec] ss:$16 sps:$4 sm:$0xff]  }
  0xc4   :  { %2505 = vmatprep.subr.bf16.mxu0 %v3625_v37  ;;  %2763 = vmatprep.subr.bf16.mxu1 %v3628_v38  ;;  %v3716_v37 = vld [vmem:[#allocation2 + $0x6e0] ss:$16 sps:$4 sm:$0xff]   ;;  %v3719_v38 = vld [vmem:[#allocation2 + $0x6e8] ss:$16 sps:$4 sm:$0xff]  }
  0xc7   :  { %2506 = vmatpush1.bf16.msra.mxu0 %v3623_v39  ;;  %2764 = vmatpush1.bf16.msra.mxu1 %v3626_v40  ;;  %v3724_v39 = vld [vmem:[#allocation2 + $0x704] ss:$16 sps:$4 sm:$0xff]   ;;  %v3727_v40 = vld [vmem:[#allocation2 + $0x70c] ss:$16 sps:$4 sm:$0xff]  }
  0xc8   :  { %2507 = vmatprep.subr.bf16.mxu0 %v3631_v41  ;;  %2765 = vmatprep.subr.bf16.mxu1 %v3634_v42  ;;  %v3722_v41 = vld [vmem:[#allocation2 + $0x700] ss:$16 sps:$4 sm:$0xff]   ;;  %v3725_v42 = vld [vmem:[#allocation2 + $0x708] ss:$16 sps:$4 sm:$0xff]  }
  0xcb   :  { %2508 = vmatpush1.bf16.msra.mxu0 %v3629_v43  ;;  %2766 = vmatpush1.bf16.msra.mxu1 %v3632_v44  ;;  %v3730_v43 = vld [vmem:[#allocation2 + $0x724] ss:$16 sps:$4 sm:$0xff]   ;;  %v3733_v44 = vld [vmem:[#allocation2 + $0x72c] ss:$16 sps:$4 sm:$0xff]  }
  0xcc   :  { %2509 = vmatprep.subr.bf16.mxu0 %v3637_v45  ;;  %2767 = vmatprep.subr.bf16.mxu1 %v3640_v46  ;;  %v3728_v45 = vld [vmem:[#allocation2 + $0x720] ss:$16 sps:$4 sm:$0xff]   ;;  %v3731_v46 = vld [vmem:[#allocation2 + $0x728] ss:$16 sps:$4 sm:$0xff]  }
  0xcf   :  { %2510 = vmatpush1.bf16.msra.mxu0 %v3635_v47  ;;  %2768 = vmatpush1.bf16.msra.mxu1 %v3638_v48  ;;  %v3736_v47 = vld [vmem:[#allocation2 + $0x744] ss:$16 sps:$4 sm:$0xff]   ;;  %v3739_v48 = vld [vmem:[#allocation2 + $0x74c] ss:$16 sps:$4 sm:$0xff]  }
  0xd0   :  { %2511 = vmatprep.subr.bf16.mxu0 %v3643_v49  ;;  %2769 = vmatprep.subr.bf16.mxu1 %v3646_v50  ;;  %v3734_v49 = vld [vmem:[#allocation2 + $0x740] ss:$16 sps:$4 sm:$0xff]   ;;  %v3737_v50 = vld [vmem:[#allocation2 + $0x748] ss:$16 sps:$4 sm:$0xff]  }
  0xd3   :  { %2512 = vmatpush1.bf16.msra.mxu0 %v3641_v51  ;;  %2770 = vmatpush1.bf16.msra.mxu1 %v3644_v52  ;;  %v3742_v51 = vld [vmem:[#allocation2 + $0x764] ss:$16 sps:$4 sm:$0xff]   ;;  %v3745_v52 = vld [vmem:[#allocation2 + $0x76c] ss:$16 sps:$4 sm:$0xff]  }
  0xd4   :  { %2513 = vmatprep.subr.bf16.mxu0 %v3649_v53  ;;  %2771 = vmatprep.subr.bf16.mxu1 %v3652_v54  ;;  %v3740_v53 = vld [vmem:[#allocation2 + $0x760] ss:$16 sps:$4 sm:$0xff]   ;;  %v3743_v54 = vld [vmem:[#allocation2 + $0x768] ss:$16 sps:$4 sm:$0xff]  }
  0xd7   :  { %2514 = vmatpush1.bf16.msra.mxu0 %v3647_v55  ;;  %2772 = vmatpush1.bf16.msra.mxu1 %v3650_v56  ;;  %v3748_v55 = vld [vmem:[#allocation2 + $0x784] ss:$16 sps:$4 sm:$0xff]   ;;  %v3751_v56 = vld [vmem:[#allocation2 + $0x78c] ss:$16 sps:$4 sm:$0xff]  }
  0xd8   :  { %2515 = vmatprep.subr.bf16.mxu0 %v3655_v57  ;;  %2773 = vmatprep.subr.bf16.mxu1 %v3658_v58  ;;  %v3746_v57 = vld [vmem:[#allocation2 + $0x780] ss:$16 sps:$4 sm:$0xff]   ;;  %v3749_v58 = vld [vmem:[#allocation2 + $0x788] ss:$16 sps:$4 sm:$0xff]  }
  0xdb   :  { %2516 = vmatpush1.bf16.msra.mxu0 %v3653_v59  ;;  %2774 = vmatpush1.bf16.msra.mxu1 %v3656_v60  ;;  %v3754_v59 = vld [vmem:[#allocation2 + $0x7a4] ss:$16 sps:$4 sm:$0xff]   ;;  %v3757_v60 = vld [vmem:[#allocation2 + $0x7ac] ss:$16 sps:$4 sm:$0xff]  }
  0xdc   :  { %2517 = vmatprep.subr.bf16.mxu0 %v3661_v61  ;;  %2775 = vmatprep.subr.bf16.mxu1 %v3664_v62  ;;  %v3752_v61 = vld [vmem:[#allocation2 + $0x7a0] ss:$16 sps:$4 sm:$0xff]   ;;  %v3755_v62 = vld [vmem:[#allocation2 + $0x7a8] ss:$16 sps:$4 sm:$0xff]  }
  0xdf   :  { %2518 = vmatpush1.bf16.msra.mxu0 %v3659_v63  ;;  %2776 = vmatpush1.bf16.msra.mxu1 %v3662_v0  ;;  %v3760_v63 = vld [vmem:[#allocation2 + $0x7c4] ss:$16 sps:$4 sm:$0xff]   ;;  %v3763_v0 = vld [vmem:[#allocation2 + $0x7cc] ss:$16 sps:$4 sm:$0xff]  }
  0xe0   :  { %2519 = vmatprep.subr.bf16.mxu0 %v3667_v1  ;;  %2777 = vmatprep.subr.bf16.mxu1 %v3670_v2  ;;  %v3758_v1 = vld [vmem:[#allocation2 + $0x7c0] ss:$16 sps:$4 sm:$0xff]   ;;  %v3761_v2 = vld [vmem:[#allocation2 + $0x7c8] ss:$16 sps:$4 sm:$0xff]  }
  0xe3   :  { %2520 = vmatpush1.bf16.msra.mxu0 %v3665_v3  ;;  %2778 = vmatpush1.bf16.msra.mxu1 %v3668_v4  ;;  %v3766_v3 = vld [vmem:[#allocation2 + $0x7e4] ss:$16 sps:$4 sm:$0xff]   ;;  %v3769_v4 = vld [vmem:[#allocation2 + $0x7ec] ss:$16 sps:$4 sm:$0xff]  }
  0xe4   :  { %2532 = vmatprep.subr.bf16.mxu0 %v3676_v5  ;;  %2790 = vmatprep.subr.bf16.mxu1 %v3679_v6  ;;  %v3764_v5 = vld [vmem:[#allocation2 + $0x7e0] ss:$16 sps:$4 sm:$0xff]   ;;  %v3767_v6 = vld [vmem:[#allocation2 + $0x7e8] ss:$16 sps:$4 sm:$0xff]  }
  0xe6   :  { %2522 = vmatmul.mubr.bf16.vlgmr.msra.gmra.mrb[0].mxu0 %v3671_v7  ;;  %2780 = vmatmul.mubr.bf16.vlgmr.msra.gmra.mrb[0].mxu1 %v3671_v7  ;;  %v3775_v7 = vld [vmem:[#allocation2 + $0x804] ss:$16 sps:$4 sm:$0xff]  }
  0xe7   :  { %2533 = vmatpush1.bf16.msra.mxu0 %v3674_v8  ;;  %2791 = vmatpush1.bf16.msra.mxu1 %v3677_v9  ;;  %v3778_v8 = vld [vmem:[#allocation2 + $0x80c] ss:$16 sps:$4 sm:$0xff]   ;;  %v3770_v9 = vld [vmem:[%s4115_s0 + $0x18] ss:$48 sps:$4 sm:$0xff]  }
  0xe8   :  { %2534 = vmatprep.subr.bf16.mxu0 %v3682_v10  ;;  %2792 = vmatprep.subr.bf16.mxu1 %v3685_v11  ;;  %v3773_v10 = vld [vmem:[#allocation2 + $0x800] ss:$16 sps:$4 sm:$0xff]   ;;  %v3776_v11 = vld [vmem:[#allocation2 + $0x808] ss:$16 sps:$4 sm:$0xff]  }
  0xe9   :  { %2564 = vmatprep.mubr.bf16.mxu0 %v3772_v12  ;;  %2822 = vmatprep.mubr.bf16.mxu1 %v3772_v12  ;;  %v3781_v12 = vld [vmem:[#allocation2 + $0x824] ss:$16 sps:$4 sm:$0xff]  }
  0xeb   :  { %2535 = vmatpush1.bf16.msra.mxu0 %v3680_v13  ;;  %2793 = vmatpush1.bf16.msra.mxu1 %v3683_v14  ;;  %v3784_v13 = vld [vmem:[#allocation2 + $0x82c] ss:$16 sps:$4 sm:$0xff]   ;;  %v3871_v14 = vld [vmem:[%s4115_s0 + $0x24] ss:$48 sps:$4 sm:$0xff]  }
  0xec   :  { %2536 = vmatprep.subr.bf16.mxu0 %v3688_v15  ;;  %2794 = vmatprep.subr.bf16.mxu1 %v3691_v16  ;;  %v3779_v15 = vld [vmem:[#allocation2 + $0x820] ss:$16 sps:$4 sm:$0xff]   ;;  %v3782_v16 = vld [vmem:[#allocation2 + $0x828] ss:$16 sps:$4 sm:$0xff]  }
  0xef   :  { %2537 = vmatpush1.bf16.msra.mxu0 %v3686_v17  ;;  %2795 = vmatpush1.bf16.msra.mxu1 %v3689_v18  ;;  %v3787_v17 = vld [vmem:[#allocation2 + $0x844] ss:$16 sps:$4 sm:$0xff]   ;;  %v3790_v18 = vld [vmem:[#allocation2 + $0x84c] ss:$16 sps:$4 sm:$0xff]  }
  0xf0   :  { %2538 = vmatprep.subr.bf16.mxu0 %v3694_v19  ;;  %2796 = vmatprep.subr.bf16.mxu1 %v3697_v20  ;;  %v3785_v19 = vld [vmem:[#allocation2 + $0x840] ss:$16 sps:$4 sm:$0xff]   ;;  %v3788_v20 = vld [vmem:[#allocation2 + $0x848] ss:$16 sps:$4 sm:$0xff]  }
  0xf3   :  { %2539 = vmatpush1.bf16.msra.mxu0 %v3692_v21  ;;  %2797 = vmatpush1.bf16.msra.mxu1 %v3695_v22  ;;  %v3793_v21 = vld [vmem:[#allocation2 + $0x864] ss:$16 sps:$4 sm:$0xff]   ;;  %v3796_v22 = vld [vmem:[#allocation2 + $0x86c] ss:$16 sps:$4 sm:$0xff]  }
  0xf4   :  { %2540 = vmatprep.subr.bf16.mxu0 %v3700_v23  ;;  %2798 = vmatprep.subr.bf16.mxu1 %v3703_v24  ;;  %v3791_v23 = vld [vmem:[#allocation2 + $0x860] ss:$16 sps:$4 sm:$0xff]   ;;  %v3794_v24 = vld [vmem:[#allocation2 + $0x868] ss:$16 sps:$4 sm:$0xff]  }
  0xf7   :  { %2541 = vmatpush1.bf16.msra.mxu0 %v3698_v25  ;;  %2799 = vmatpush1.bf16.msra.mxu1 %v3701_v26  ;;  %v3799_v25 = vld [vmem:[#allocation2 + $0x884] ss:$16 sps:$4 sm:$0xff]   ;;  %v3802_v26 = vld [vmem:[#allocation2 + $0x88c] ss:$16 sps:$4 sm:$0xff]  }
  0xf8   :  { %2542 = vmatprep.subr.bf16.mxu0 %v3706_v27  ;;  %2800 = vmatprep.subr.bf16.mxu1 %v3709_v28  ;;  %v3797_v27 = vld [vmem:[#allocation2 + $0x880] ss:$16 sps:$4 sm:$0xff]   ;;  %v3800_v28 = vld [vmem:[#allocation2 + $0x888] ss:$16 sps:$4 sm:$0xff]  }
  0xfb   :  { %2543 = vmatpush1.bf16.msra.mxu0 %v3704_v29  ;;  %2801 = vmatpush1.bf16.msra.mxu1 %v3707_v30  ;;  %v3805_v29 = vld [vmem:[#allocation2 + $0x8a4] ss:$16 sps:$4 sm:$0xff]   ;;  %v3808_v30 = vld [vmem:[#allocation2 + $0x8ac] ss:$16 sps:$4 sm:$0xff]  }
  0xfc   :  { %2544 = vmatprep.subr.bf16.mxu0 %v3712_v31  ;;  %2802 = vmatprep.subr.bf16.mxu1 %v3715_v32  ;;  %v3803_v31 = vld [vmem:[#allocation2 + $0x8a0] ss:$16 sps:$4 sm:$0xff]   ;;  %v3806_v32 = vld [vmem:[#allocation2 + $0x8a8] ss:$16 sps:$4 sm:$0xff]  }
  0xff   :  { %2545 = vmatpush1.bf16.msra.mxu0 %v3710_v33  ;;  %2803 = vmatpush1.bf16.msra.mxu1 %v3713_v34  ;;  %v3811_v33 = vld [vmem:[#allocation2 + $0x8c4] ss:$16 sps:$4 sm:$0xff]   ;;  %v3814_v34 = vld [vmem:[#allocation2 + $0x8cc] ss:$16 sps:$4 sm:$0xff]  }
 0x100   :  { %2546 = vmatprep.subr.bf16.mxu0 %v3718_v35  ;;  %2804 = vmatprep.subr.bf16.mxu1 %v3721_v36  ;;  %v3809_v35 = vld [vmem:[#allocation2 + $0x8c0] ss:$16 sps:$4 sm:$0xff]   ;;  %v3812_v36 = vld [vmem:[#allocation2 + $0x8c8] ss:$16 sps:$4 sm:$0xff]  }
 0x103   :  { %2547 = vmatpush1.bf16.msra.mxu0 %v3716_v37  ;;  %2805 = vmatpush1.bf16.msra.mxu1 %v3719_v38  ;;  %v3817_v37 = vld [vmem:[#allocation2 + $0x8e4] ss:$16 sps:$4 sm:$0xff]   ;;  %v3820_v38 = vld [vmem:[#allocation2 + $0x8ec] ss:$16 sps:$4 sm:$0xff]  }
 0x104   :  { %2548 = vmatprep.subr.bf16.mxu0 %v3724_v39  ;;  %2806 = vmatprep.subr.bf16.mxu1 %v3727_v40  ;;  %v3815_v39 = vld [vmem:[#allocation2 + $0x8e0] ss:$16 sps:$4 sm:$0xff]   ;;  %v3818_v40 = vld [vmem:[#allocation2 + $0x8e8] ss:$16 sps:$4 sm:$0xff]  }
 0x107   :  { %2549 = vmatpush1.bf16.msra.mxu0 %v3722_v41  ;;  %2807 = vmatpush1.bf16.msra.mxu1 %v3725_v42  ;;  %v3823_v41 = vld [vmem:[#allocation2 + $0x904] ss:$16 sps:$4 sm:$0xff]   ;;  %v3826_v42 = vld [vmem:[#allocation2 + $0x90c] ss:$16 sps:$4 sm:$0xff]  }
 0x108   :  { %2550 = vmatprep.subr.bf16.mxu0 %v3730_v43  ;;  %2808 = vmatprep.subr.bf16.mxu1 %v3733_v44  ;;  %v3821_v43 = vld [vmem:[#allocation2 + $0x900] ss:$16 sps:$4 sm:$0xff]   ;;  %v3824_v44 = vld [vmem:[#allocation2 + $0x908] ss:$16 sps:$4 sm:$0xff]  }
 0x10b   :  { %2551 = vmatpush1.bf16.msra.mxu0 %v3728_v45  ;;  %2809 = vmatpush1.bf16.msra.mxu1 %v3731_v46  ;;  %v3829_v45 = vld [vmem:[#allocation2 + $0x924] ss:$16 sps:$4 sm:$0xff]   ;;  %v3832_v46 = vld [vmem:[#allocation2 + $0x92c] ss:$16 sps:$4 sm:$0xff]  }
 0x10c   :  { %2552 = vmatprep.subr.bf16.mxu0 %v3736_v47  ;;  %2810 = vmatprep.subr.bf16.mxu1 %v3739_v48  ;;  %v3827_v47 = vld [vmem:[#allocation2 + $0x920] ss:$16 sps:$4 sm:$0xff]   ;;  %v3830_v48 = vld [vmem:[#allocation2 + $0x928] ss:$16 sps:$4 sm:$0xff]  }
 0x10f   :  { %2553 = vmatpush1.bf16.msra.mxu0 %v3734_v49  ;;  %2811 = vmatpush1.bf16.msra.mxu1 %v3737_v50  ;;  %v3835_v49 = vld [vmem:[#allocation2 + $0x944] ss:$16 sps:$4 sm:$0xff]   ;;  %v3838_v50 = vld [vmem:[#allocation2 + $0x94c] ss:$16 sps:$4 sm:$0xff]  }
 0x110   :  { %2554 = vmatprep.subr.bf16.mxu0 %v3742_v51  ;;  %2812 = vmatprep.subr.bf16.mxu1 %v3745_v52  ;;  %v3833_v51 = vld [vmem:[#allocation2 + $0x940] ss:$16 sps:$4 sm:$0xff]   ;;  %v3836_v52 = vld [vmem:[#allocation2 + $0x948] ss:$16 sps:$4 sm:$0xff]  }
 0x113   :  { %2555 = vmatpush1.bf16.msra.mxu0 %v3740_v53  ;;  %2813 = vmatpush1.bf16.msra.mxu1 %v3743_v54  ;;  %v3841_v53 = vld [vmem:[#allocation2 + $0x964] ss:$16 sps:$4 sm:$0xff]   ;;  %v3844_v54 = vld [vmem:[#allocation2 + $0x96c] ss:$16 sps:$4 sm:$0xff]  }
 0x114   :  { %2556 = vmatprep.subr.bf16.mxu0 %v3748_v55  ;;  %2814 = vmatprep.subr.bf16.mxu1 %v3751_v56  ;;  %v3839_v55 = vld [vmem:[#allocation2 + $0x960] ss:$16 sps:$4 sm:$0xff]   ;;  %v3842_v56 = vld [vmem:[#allocation2 + $0x968] ss:$16 sps:$4 sm:$0xff]  }
 0x117   :  { %2557 = vmatpush1.bf16.msra.mxu0 %v3746_v57  ;;  %2815 = vmatpush1.bf16.msra.mxu1 %v3749_v58  ;;  %v3847_v57 = vld [vmem:[#allocation2 + $0x984] ss:$16 sps:$4 sm:$0xff]   ;;  %v3850_v58 = vld [vmem:[#allocation2 + $0x98c] ss:$16 sps:$4 sm:$0xff]  }
 0x118   :  { %2558 = vmatprep.subr.bf16.mxu0 %v3754_v59  ;;  %2816 = vmatprep.subr.bf16.mxu1 %v3757_v60  ;;  %v3845_v59 = vld [vmem:[#allocation2 + $0x980] ss:$16 sps:$4 sm:$0xff]   ;;  %v3848_v60 = vld [vmem:[#allocation2 + $0x988] ss:$16 sps:$4 sm:$0xff]  }
 0x11b   :  { %2559 = vmatpush1.bf16.msra.mxu0 %v3752_v61  ;;  %2817 = vmatpush1.bf16.msra.mxu1 %v3755_v62  ;;  %v3853_v61 = vld [vmem:[#allocation2 + $0x9a4] ss:$16 sps:$4 sm:$0xff]   ;;  %v3856_v62 = vld [vmem:[#allocation2 + $0x9ac] ss:$16 sps:$4 sm:$0xff]  }
 0x11c   :  { %2560 = vmatprep.subr.bf16.mxu0 %v3760_v63  ;;  %2818 = vmatprep.subr.bf16.mxu1 %v3763_v0  ;;  %v3851_v63 = vld [vmem:[#allocation2 + $0x9a0] ss:$16 sps:$4 sm:$0xff]   ;;  %v3854_v0 = vld [vmem:[#allocation2 + $0x9a8] ss:$16 sps:$4 sm:$0xff]  }
 0x11f   :  { %2561 = vmatpush1.bf16.msra.mxu0 %v3758_v1  ;;  %2819 = vmatpush1.bf16.msra.mxu1 %v3761_v2  ;;  %v3859_v1 = vld [vmem:[#allocation2 + $0x9c4] ss:$16 sps:$4 sm:$0xff]   ;;  %v3862_v2 = vld [vmem:[#allocation2 + $0x9cc] ss:$16 sps:$4 sm:$0xff]  }
 0x120   :  { %2562 = vmatprep.subr.bf16.mxu0 %v3766_v3  ;;  %2820 = vmatprep.subr.bf16.mxu1 %v3769_v4  ;;  %v3857_v3 = vld [vmem:[#allocation2 + $0x9c0] ss:$16 sps:$4 sm:$0xff]   ;;  %v3860_v4 = vld [vmem:[#allocation2 + $0x9c8] ss:$16 sps:$4 sm:$0xff]  }
 0x123   :  { %2563 = vmatpush1.bf16.msra.mxu0 %v3764_v5  ;;  %2821 = vmatpush1.bf16.msra.mxu1 %v3767_v6  ;;  %v3865_v5 = vld [vmem:[#allocation2 + $0x9e4] ss:$16 sps:$4 sm:$0xff]   ;;  %v3868_v6 = vld [vmem:[#allocation2 + $0x9ec] ss:$16 sps:$4 sm:$0xff]  }
 0x124   :  { %2575 = vmatprep.subr.bf16.mxu0 %v3775_v7  ;;  %2833 = vmatprep.subr.bf16.mxu1 %v3778_v8  ;;  %v3863_v7 = vld [vmem:[#allocation2 + $0x9e0] ss:$16 sps:$4 sm:$0xff]   ;;  %v3866_v8 = vld [vmem:[#allocation2 + $0x9e8] ss:$16 sps:$4 sm:$0xff]  }
 0x126   :  { %2565 = vmatmul.mubr.bf16.vlgmr.msra.gmra.mrb[0].mxu0 %v3770_v9  ;;  %2823 = vmatmul.mubr.bf16.vlgmr.msra.gmra.mrb[0].mxu1 %v3770_v9  ;;  %v3874_v9 = vld [vmem:[#allocation2 + $0xa04] ss:$16 sps:$4 sm:$0xff]  }
 0x127   :  { %2576 = vmatpush1.bf16.msra.mxu0 %v3773_v10  ;;  %2834 = vmatpush1.bf16.msra.mxu1 %v3776_v11  ;;  %v3877_v10 = vld [vmem:[#allocation2 + $0xa0c] ss:$16 sps:$4 sm:$0xff]   ;;  %v3869_v11 = vld [vmem:[%s4115_s0 + $0x20] ss:$48 sps:$4 sm:$0xff]  }
 0x128   :  { %2577 = vmatprep.subr.bf16.mxu0 %v3781_v12  ;;  %2835 = vmatprep.subr.bf16.mxu1 %v3784_v13  ;;  %v3872_v12 = vld [vmem:[#allocation2 + $0xa00] ss:$16 sps:$4 sm:$0xff]   ;;  %v3875_v13 = vld [vmem:[#allocation2 + $0xa08] ss:$16 sps:$4 sm:$0xff]  }
 0x129   :  { %2607 = vmatprep.mubr.bf16.mxu0 %v3871_v14  ;;  %2865 = vmatprep.mubr.bf16.mxu1 %v3871_v14  ;;  %v3880_v14 = vld [vmem:[#allocation2 + $0xa24] ss:$16 sps:$4 sm:$0xff]  }
 0x12b   :  { %2578 = vmatpush1.bf16.msra.mxu0 %v3779_v15  ;;  %2836 = vmatpush1.bf16.msra.mxu1 %v3782_v16  ;;  %v3883_v15 = vld [vmem:[#allocation2 + $0xa2c] ss:$16 sps:$4 sm:$0xff]  }
 0x12c   :  { %2579 = vmatprep.subr.bf16.mxu0 %v3787_v17  ;;  %2837 = vmatprep.subr.bf16.mxu1 %v3790_v18  ;;  %v3956_v16 = vld [vmem:[%s4115_s0 + $0x2c] ss:$48 sps:$4 sm:$0xff]   ;;  %v3878_v17 = vld [vmem:[#allocation2 + $0xa20] ss:$16 sps:$4 sm:$0xff]   ;;  %v3881_v18 = vld [vmem:[#allocation2 + $0xa28] ss:$16 sps:$4 sm:$0xff]  }
 0x12f   :  { %2580 = vmatpush1.bf16.msra.mxu0 %v3785_v19  ;;  %2838 = vmatpush1.bf16.msra.mxu1 %v3788_v20  ;;  %v3886_v19 = vld [vmem:[#allocation2 + $0xa44] ss:$16 sps:$4 sm:$0xff]   ;;  %v3889_v20 = vld [vmem:[#allocation2 + $0xa4c] ss:$16 sps:$4 sm:$0xff]  }
 0x130   :  { %2581 = vmatprep.subr.bf16.mxu0 %v3793_v21  ;;  %2839 = vmatprep.subr.bf16.mxu1 %v3796_v22  ;;  %v3884_v21 = vld [vmem:[#allocation2 + $0xa40] ss:$16 sps:$4 sm:$0xff]   ;;  %v3887_v22 = vld [vmem:[#allocation2 + $0xa48] ss:$16 sps:$4 sm:$0xff]  }
 0x133   :  { %2582 = vmatpush1.bf16.msra.mxu0 %v3791_v23  ;;  %2840 = vmatpush1.bf16.msra.mxu1 %v3794_v24  ;;  %v3892_v23 = vld [vmem:[#allocation2 + $0xa64] ss:$16 sps:$4 sm:$0xff]   ;;  %v3895_v24 = vld [vmem:[#allocation2 + $0xa6c] ss:$16 sps:$4 sm:$0xff]  }
 0x134   :  { %2583 = vmatprep.subr.bf16.mxu0 %v3799_v25  ;;  %2841 = vmatprep.subr.bf16.mxu1 %v3802_v26  ;;  %v3890_v25 = vld [vmem:[#allocation2 + $0xa60] ss:$16 sps:$4 sm:$0xff]   ;;  %v3893_v26 = vld [vmem:[#allocation2 + $0xa68] ss:$16 sps:$4 sm:$0xff]  }
 0x137   :  { %2584 = vmatpush1.bf16.msra.mxu0 %v3797_v27  ;;  %2842 = vmatpush1.bf16.msra.mxu1 %v3800_v28  ;;  %v3898_v27 = vld [vmem:[#allocation2 + $0xa84] ss:$16 sps:$4 sm:$0xff]   ;;  %v3901_v28 = vld [vmem:[#allocation2 + $0xa8c] ss:$16 sps:$4 sm:$0xff]  }
 0x138   :  { %2585 = vmatprep.subr.bf16.mxu0 %v3805_v29  ;;  %2843 = vmatprep.subr.bf16.mxu1 %v3808_v30  ;;  %v3896_v29 = vld [vmem:[#allocation2 + $0xa80] ss:$16 sps:$4 sm:$0xff]   ;;  %v3899_v30 = vld [vmem:[#allocation2 + $0xa88] ss:$16 sps:$4 sm:$0xff]  }
 0x13b   :  { %2586 = vmatpush1.bf16.msra.mxu0 %v3803_v31  ;;  %2844 = vmatpush1.bf16.msra.mxu1 %v3806_v32  ;;  %v3904_v31 = vld [vmem:[#allocation2 + $0xaa4] ss:$16 sps:$4 sm:$0xff]   ;;  %v3907_v32 = vld [vmem:[#allocation2 + $0xaac] ss:$16 sps:$4 sm:$0xff]  }
 0x13c   :  { %2587 = vmatprep.subr.bf16.mxu0 %v3811_v33  ;;  %2845 = vmatprep.subr.bf16.mxu1 %v3814_v34  ;;  %v3902_v33 = vld [vmem:[#allocation2 + $0xaa0] ss:$16 sps:$4 sm:$0xff]   ;;  %v3905_v34 = vld [vmem:[#allocation2 + $0xaa8] ss:$16 sps:$4 sm:$0xff]  }
 0x13f   :  { %2588 = vmatpush1.bf16.msra.mxu0 %v3809_v35  ;;  %2846 = vmatpush1.bf16.msra.mxu1 %v3812_v36  ;;  %v3910_v35 = vld [vmem:[#allocation2 + $0xac4] ss:$16 sps:$4 sm:$0xff]   ;;  %v3913_v36 = vld [vmem:[#allocation2 + $0xacc] ss:$16 sps:$4 sm:$0xff]  }
 0x140   :  { %2589 = vmatprep.subr.bf16.mxu0 %v3817_v37  ;;  %2847 = vmatprep.subr.bf16.mxu1 %v3820_v38  ;;  %v3908_v37 = vld [vmem:[#allocation2 + $0xac0] ss:$16 sps:$4 sm:$0xff]   ;;  %v3911_v38 = vld [vmem:[#allocation2 + $0xac8] ss:$16 sps:$4 sm:$0xff]  }
 0x143   :  { %2590 = vmatpush1.bf16.msra.mxu0 %v3815_v39  ;;  %2848 = vmatpush1.bf16.msra.mxu1 %v3818_v40  ;;  %v3916_v39 = vld [vmem:[#allocation2 + $0xae4] ss:$16 sps:$4 sm:$0xff]   ;;  %v3919_v40 = vld [vmem:[#allocation2 + $0xaec] ss:$16 sps:$4 sm:$0xff]  }
 0x144   :  { %2591 = vmatprep.subr.bf16.mxu0 %v3823_v41  ;;  %2849 = vmatprep.subr.bf16.mxu1 %v3826_v42  ;;  %v3914_v41 = vld [vmem:[#allocation2 + $0xae0] ss:$16 sps:$4 sm:$0xff]   ;;  %v3917_v42 = vld [vmem:[#allocation2 + $0xae8] ss:$16 sps:$4 sm:$0xff]  }
 0x147   :  { %2592 = vmatpush1.bf16.msra.mxu0 %v3821_v43  ;;  %2850 = vmatpush1.bf16.msra.mxu1 %v3824_v44  ;;  %v3922_v43 = vld [vmem:[#allocation2 + $0xb04] ss:$16 sps:$4 sm:$0xff]   ;;  %v3925_v44 = vld [vmem:[#allocation2 + $0xb0c] ss:$16 sps:$4 sm:$0xff]  }
 0x148   :  { %2593 = vmatprep.subr.bf16.mxu0 %v3829_v45  ;;  %2851 = vmatprep.subr.bf16.mxu1 %v3832_v46  ;;  %v3920_v45 = vld [vmem:[#allocation2 + $0xb00] ss:$16 sps:$4 sm:$0xff]   ;;  %v3923_v46 = vld [vmem:[#allocation2 + $0xb08] ss:$16 sps:$4 sm:$0xff]  }
 0x14b   :  { %2594 = vmatpush1.bf16.msra.mxu0 %v3827_v47  ;;  %2852 = vmatpush1.bf16.msra.mxu1 %v3830_v48  ;;  %v3928_v47 = vld [vmem:[#allocation2 + $0xb24] ss:$16 sps:$4 sm:$0xff]   ;;  %v3931_v48 = vld [vmem:[#allocation2 + $0xb2c] ss:$16 sps:$4 sm:$0xff]  }
 0x14c   :  { %2595 = vmatprep.subr.bf16.mxu0 %v3835_v49  ;;  %2853 = vmatprep.subr.bf16.mxu1 %v3838_v50  ;;  %v3926_v49 = vld [vmem:[#allocation2 + $0xb20] ss:$16 sps:$4 sm:$0xff]   ;;  %v3929_v50 = vld [vmem:[#allocation2 + $0xb28] ss:$16 sps:$4 sm:$0xff]  }
 0x14f   :  { %2596 = vmatpush1.bf16.msra.mxu0 %v3833_v51  ;;  %2854 = vmatpush1.bf16.msra.mxu1 %v3836_v52  ;;  %v3934_v51 = vld [vmem:[#allocation2 + $0xb44] ss:$16 sps:$4 sm:$0xff]   ;;  %v3937_v52 = vld [vmem:[#allocation2 + $0xb4c] ss:$16 sps:$4 sm:$0xff]  }
 0x150   :  { %2597 = vmatprep.subr.bf16.mxu0 %v3841_v53  ;;  %2855 = vmatprep.subr.bf16.mxu1 %v3844_v54  ;;  %v3932_v53 = vld [vmem:[#allocation2 + $0xb40] ss:$16 sps:$4 sm:$0xff]   ;;  %v3935_v54 = vld [vmem:[#allocation2 + $0xb48] ss:$16 sps:$4 sm:$0xff]  }
 0x153   :  { %2598 = vmatpush1.bf16.msra.mxu0 %v3839_v55  ;;  %2856 = vmatpush1.bf16.msra.mxu1 %v3842_v56  ;;  %v3940_v55 = vld [vmem:[#allocation2 + $0xb64] ss:$16 sps:$4 sm:$0xff]   ;;  %v3943_v56 = vld [vmem:[#allocation2 + $0xb6c] ss:$16 sps:$4 sm:$0xff]  }
 0x154   :  { %2599 = vmatprep.subr.bf16.mxu0 %v3847_v57  ;;  %2857 = vmatprep.subr.bf16.mxu1 %v3850_v58  ;;  %v3938_v57 = vld [vmem:[#allocation2 + $0xb60] ss:$16 sps:$4 sm:$0xff]   ;;  %v3941_v58 = vld [vmem:[#allocation2 + $0xb68] ss:$16 sps:$4 sm:$0xff]  }
 0x157   :  { %2600 = vmatpush1.bf16.msra.mxu0 %v3845_v59  ;;  %2858 = vmatpush1.bf16.msra.mxu1 %v3848_v60  ;;  %v3946_v59 = vld [vmem:[#allocation2 + $0xb84] ss:$16 sps:$4 sm:$0xff]   ;;  %v3949_v60 = vld [vmem:[#allocation2 + $0xb8c] ss:$16 sps:$4 sm:$0xff]  }
 0x158   :  { %2601 = vmatprep.subr.bf16.mxu0 %v3853_v61  ;;  %2859 = vmatprep.subr.bf16.mxu1 %v3856_v62  ;;  %v3944_v61 = vld [vmem:[#allocation2 + $0xb80] ss:$16 sps:$4 sm:$0xff]   ;;  %v3947_v62 = vld [vmem:[#allocation2 + $0xb88] ss:$16 sps:$4 sm:$0xff]  }
 0x15b   :  { %2602 = vmatpush1.bf16.msra.mxu0 %v3851_v63  ;;  %2860 = vmatpush1.bf16.msra.mxu1 %v3854_v0  ;;  %v3950_v63 = vld [vmem:[#allocation2 + $0xba4] ss:$16 sps:$4 sm:$0x3f]   ;;  %v3952_v0 = vld [vmem:[#allocation2 + $0xbac] ss:$16 sps:$4 sm:$0x3f]  }
 0x15c   :  { %2603 = vmatprep.subr.bf16.mxu0 %v3859_v1  ;;  %2861 = vmatprep.subr.bf16.mxu1 %v3862_v2  ;;  %v3954_v1 = vld [vmem:[#allocation2 + $0xba0] ss:$16 sps:$4 sm:$0x3f]   ;;  %v3955_v2 = vld [vmem:[#allocation2 + $0xba8] ss:$16 sps:$4 sm:$0x3f]  }
 0x15f   :  { %2604 = vmatpush1.bf16.msra.mxu0 %v3857_v3  ;;  %2862 = vmatpush1.bf16.msra.mxu1 %v3860_v4  ;;  %v2392_v3 = vsel %vm2390_vm1, %v3954_v1, 0  ;;  %v2398_v4 = vsel %vm2390_vm1, %v3955_v2, 0 }
 0x160   :  { %2605 = vmatprep.subr.bf16.mxu0 %v3865_v5  ;;  %2863 = vmatprep.subr.bf16.mxu1 %v3868_v6  ;;  %v3958_v5 = vld [vmem:[%s4115_s0 + $0x28] ss:$48 sps:$4 sm:$0xff]   ;;  %v431_v6 = vlaneseq }
 0x163   :  { %2606 = vmatpush1.bf16.msra.mxu0 %v3863_v7  ;;  %2864 = vmatpush1.bf16.msra.mxu1 %v3866_v8  ;;  %v432_v7 = vshrl.u32 %v431_v6, 7 }
 0x164   :  { %2618 = vmatprep.subr.bf16.mxu0 %v3874_v9  ;;  %2876 = vmatprep.subr.bf16.mxu1 %v3877_v10  ;;  %v429_v10 = vld [vmem:[#allocation4] sm:$0xf] }
 0x165   :  { %v433_v8 = vsub.s32 0, %v432_v7  ;;  %v441_v9 = vsub.s32 2, %v432_v7 }
 0x166   :  { %2608 = vmatmul.mubr.bf16.vlgmr.msra.gmra.mrb[0].mxu0 %v3869_v11  ;;  %2866 = vmatmul.mubr.bf16.vlgmr.msra.gmra.mrb[0].mxu1 %v3869_v11  ;;  %v437_v11 = vsub.s32 1, %v432_v7 }
 0x167   :  { %2619 = vmatpush1.bf16.msra.mxu0 %v3872_v12  ;;  %2877 = vmatpush1.bf16.msra.mxu1 %v3875_v13  ;;  %v445_v12 = vsub.s32 3, %v432_v7  ;;  %v434_v13 = vrot.slane %v429_v10, %v433_v8 }
 0x168   :  { %2620 = vmatprep.subr.bf16.mxu0 %v3880_v14  ;;  %2878 = vmatprep.subr.bf16.mxu1 %v3883_v15  ;;  %v442_v14 = vrot.slane %v429_v10, %v441_v9  ;;  %v438_v15 = vrot.slane %v429_v10, %v437_v11 }
 0x169   :  { %3322 = vmatprep.mubr.msk.bf16.mxu0 %vm2386_vm0, %v3956_v16  ;;  %3324 = vmatprep.mubr.msk.bf16.mxu1 %vm2386_vm0, %v3956_v16  ;;  %v446_v16 = vrot.slane %v429_v10, %v445_v12 }
 0x16b   :  { %2621 = vmatpush1.bf16.msra.mxu0 %v3878_v17  ;;  %2879 = vmatpush1.bf16.msra.mxu1 %v3881_v18 }
 0x16c   :  { %2622 = vmatprep.subr.bf16.mxu0 %v3886_v19  ;;  %2880 = vmatprep.subr.bf16.mxu1 %v3889_v20 }
 0x16f   :  { %2623 = vmatpush1.bf16.msra.mxu0 %v3884_v21  ;;  %2881 = vmatpush1.bf16.msra.mxu1 %v3887_v22 }
 0x170   :  { %2624 = vmatprep.subr.bf16.mxu0 %v3892_v23  ;;  %2882 = vmatprep.subr.bf16.mxu1 %v3895_v24 }
 0x173   :  { %2625 = vmatpush1.bf16.msra.mxu0 %v3890_v25  ;;  %2883 = vmatpush1.bf16.msra.mxu1 %v3893_v26 }
 0x174   :  { %2626 = vmatprep.subr.bf16.mxu0 %v3898_v27  ;;  %2884 = vmatprep.subr.bf16.mxu1 %v3901_v28 }
 0x177   :  { %2627 = vmatpush1.bf16.msra.mxu0 %v3896_v29  ;;  %2885 = vmatpush1.bf16.msra.mxu1 %v3899_v30 }
 0x178   :  { %2628 = vmatprep.subr.bf16.mxu0 %v3904_v31  ;;  %2886 = vmatprep.subr.bf16.mxu1 %v3907_v32 }
 0x17b   :  { %2629 = vmatpush1.bf16.msra.mxu0 %v3902_v33  ;;  %2887 = vmatpush1.bf16.msra.mxu1 %v3905_v34 }
 0x17c   :  { %2630 = vmatprep.subr.bf16.mxu0 %v3910_v35  ;;  %2888 = vmatprep.subr.bf16.mxu1 %v3913_v36 }
 0x17f   :  { %2631 = vmatpush1.bf16.msra.mxu0 %v3908_v37  ;;  %2889 = vmatpush1.bf16.msra.mxu1 %v3911_v38 }
 0x180   :  { %2632 = vmatprep.subr.bf16.mxu0 %v3916_v39  ;;  %2890 = vmatprep.subr.bf16.mxu1 %v3919_v40 }
 0x183   :  { %2633 = vmatpush1.bf16.msra.mxu0 %v3914_v41  ;;  %2891 = vmatpush1.bf16.msra.mxu1 %v3917_v42 }
 0x184   :  { %2634 = vmatprep.subr.bf16.mxu0 %v3922_v43  ;;  %2892 = vmatprep.subr.bf16.mxu1 %v3925_v44 }
 0x187   :  { %2635 = vmatpush1.bf16.msra.mxu0 %v3920_v45  ;;  %2893 = vmatpush1.bf16.msra.mxu1 %v3923_v46 }
 0x188   :  { %2636 = vmatprep.subr.bf16.mxu0 %v3928_v47  ;;  %2894 = vmatprep.subr.bf16.mxu1 %v3931_v48 }
 0x18b   :  { %2637 = vmatpush1.bf16.msra.mxu0 %v3926_v49  ;;  %2895 = vmatpush1.bf16.msra.mxu1 %v3929_v50 }
 0x18c   :  { %2638 = vmatprep.subr.bf16.mxu0 %v3934_v51  ;;  %2896 = vmatprep.subr.bf16.mxu1 %v3937_v52 }
 0x18f   :  { %2639 = vmatpush1.bf16.msra.mxu0 %v3932_v53  ;;  %2897 = vmatpush1.bf16.msra.mxu1 %v3935_v54 }
 0x190   :  { %2640 = vmatprep.subr.bf16.mxu0 %v3940_v55  ;;  %2898 = vmatprep.subr.bf16.mxu1 %v3943_v56 }
 0x193   :  { %2641 = vmatpush1.bf16.msra.mxu0 %v3938_v57  ;;  %2899 = vmatpush1.bf16.msra.mxu1 %v3941_v58 }
 0x194   :  { %2642 = vmatprep.subr.bf16.mxu0 %v3946_v59  ;;  %2900 = vmatprep.subr.bf16.mxu1 %v3949_v60 }
 0x197   :  { %2643 = vmatpush1.bf16.msra.mxu0 %v3944_v61  ;;  %2901 = vmatpush1.bf16.msra.mxu1 %v3947_v62 }
 0x198   :  { %3321 = vmatprep.subr.msk.bf16.mxu0 %vm2390_vm1, %v3950_v63  ;;  %3323 = vmatprep.subr.msk.bf16.mxu1 %vm2390_vm1, %v3952_v0 }
 0x19b   :  { %2645 = vmatpush1.bf16.msra.mxu0 %v2392_v3  ;;  %2903 = vmatpush1.bf16.msra.mxu1 %v2398_v4 }
 0x19e   :  { %2651 = vmatmul.mubr.bf16.vlgmr.msra.gmra.mrb[0].mxu0 %v3958_v5  ;;  %2909 = vmatmul.mubr.bf16.vlgmr.msra.gmra.mrb[0].mxu1 %v3958_v5 }
 0x271   :  { %v2652_v17 = vpop.f32.mrb[0].mxu0  ;;  %v2910_v18 = vpop.f32.mrb[0].mxu1 }
 0x272   :  { %v3325_v19 = vadd.f32 %v2652_v17, %v434_v13  ;;  %v3329_v20 = vadd.f32 %v2910_v18, %v442_v14  ;;  %v2654_v21 = vpop.f32.mrb[1].mxu0  ;;  %v2912_v22 = vpop.f32.mrb[1].mxu1 }
 0x273   :  { %v3326_v23 = vadd.f32 %v2654_v21, %v438_v15  ;;  %v3330_v24 = vadd.f32 %v2912_v22, %v446_v16  ;;  %v2656_v25 = vpop.f32.mrb[2].mxu0  ;;  %v2914_v26 = vpop.f32.mrb[2].mxu1 }
 0x274   :  { %2919 = vst [vmem:[%s4118_s3] sm:$0xff] %v3325_v19  ;;  %2921 = vst [vmem:[%s4118_s3 + $0x10] sm:$0xff] %v3329_v20  ;;  %v3327_v27 = vadd.f32 %v2656_v25, %v434_v13  ;;  %v3331_v28 = vadd.f32 %v2914_v26, %v442_v14  ;;  %v2658_v29 = vpop.f32.mrb[3].mxu0  ;;  %v2916_v30 = vpop.f32.mrb[3].mxu1 }
 0x275   :  { %2920 = vst [vmem:[%s4118_s3 + $0x8] sm:$0xff] %v3326_v23  ;;  %2922 = vst [vmem:[%s4118_s3 + $0x18] sm:$0xff] %v3330_v24  ;;  %v3328_v31 = vadd.f32 %v2658_v29, %v438_v15  ;;  %v3332_v32 = vadd.f32 %v2916_v30, %v446_v16 }
 0x276   :  { %2923 = vst [vmem:[%s4118_s3 + $0x20] sm:$0xff] %v3327_v27  ;;  %2925 = vst [vmem:[%s4118_s3 + $0x30] sm:$0xff] %v3331_v28 }
 0x277   :  { %2924 = vst [vmem:[%s4118_s3 + $0x28] sm:$0xff] %v3328_v31  ;;  %2926 = vst [vmem:[%s4118_s3 + $0x38] sm:$0xff] %v3332_v32 }
 0x278   :  { %2931 = vsyncpa [#allocation3], 1 }
 0x279   :  { %2932 = vsyncpa [#allocation5], 1 }

</bundles_post_ra>
